<compile_context>
chip_gen: v5e
topology: v5e:2x2
jax: 0.10.0
libtpu: 0.0.40
codegen_flags: <defaults>
</compile_context>

<pallas_src>
import functools

import jax
import jax.numpy as jnp
from jax import lax
from jax.experimental import pallas as pl
from jax.experimental.pallas import tpu as pltpu


def gru_gather_kernel(feat_ref, wih_ref, whh_ref, bih_ref, bhh_ref, lens_ref,
                      out_ref, *, T):
    """Single-invocation GRU recurrence + per-batch time gather.

    feat_ref: (T*B, I) f32, time-major flattened: rows [t*B, (t+1)*B) == x_t.
    wih_ref:  (I, 3H) f32 = W_ih^T   whh_ref: (H, 3H) f32 = W_hh^T
              (PyTorch gate ordering [r, z, n]).
    bih_ref / bhh_ref: (1, 3H) f32.
    lens_ref: (B, 1) i32 raw resultLen.
    out_ref:  (B, H) f32 -> hidden state latched at t == clamp(resultLen,1)-1.
    """
    B, H = out_ref.shape

    # --- One-time setup (off the serial chain) -------------------------------
    # Recurrent weights in bf16 -> the per-step dot is a single MXU pass.
    # TODO(synk): holding W_hh in the MXU weight-staging registers for the
    # whole loop (pltpu.matmul_push_rhs / matmul_acc_lhs / matmul_pop) would
    # also remove the per-step weight push; kept on jnp.dot for lowering
    # portability across jax versions.
    w_hh = whh_ref[...].astype(jnp.bfloat16)                  # (H, 3H)
    b_hh = bhh_ref[...]                                       # (1, 3H) f32
    b_hh_n = b_hh[:, 2 * H:]                                  # (1, H)  n-gate hh bias

    # Combined bias for the hoisted input projection: b_ih everywhere, plus
    # b_hh for the r/z gates (their hh-bias commutes out of the recurrence).
    col = lax.broadcasted_iota(jnp.int32, (1, 3 * H), 1)
    bias = bih_ref[...] + jnp.where(col < 2 * H, b_hh, 0.0)   # (1, 3H)

    # Input projection for ALL timesteps in one MXU matmul (bias folded in).
    gi_all = jnp.dot(feat_ref[...].astype(jnp.bfloat16),
                     wih_ref[...].astype(jnp.bfloat16),
                     preferred_element_type=jnp.float32) + bias   # (T*B, 3H) f32
    # TODO(synk): if T*B ever grows large (>~40 slabs), spill gi_all to a
    # pltpu.VMEM scratch and load one (B,3H) slab per step to keep vreg
    # pressure flat instead of holding it live across the unrolled loop.

    # Replicate the PyTorch index munging: resultLen==0 -> 1, then subtract 1.
    # NOTE: resultLen > T never latches and that row stays zero (PyTorch would
    # raise an out-of-bounds indexing error instead).
    lens = lens_ref[...]
    lens = jnp.where(lens == 0, 1, lens) - 1                  # (B, 1)
    lens_b = jnp.broadcast_to(lens, (B, H))                   # hoisted broadcast

    h = jnp.zeros((B, H), jnp.float32)
    out = jnp.zeros((B, H), jnp.float32)

    # --- Serial recurrence: fully unrolled static time loop ------------------
    for t in range(T):
        gi = gi_all[t * B:(t + 1) * B, :]                     # (B, 3H) aligned slab
        gh = jnp.dot(h.astype(jnp.bfloat16), w_hh,
                     preferred_element_type=jnp.float32)      # single-pass MXU
        rz = jax.nn.sigmoid(gi[:, :2 * H] + gh[:, :2 * H])    # one 2H-lane sigmoid
        r = rz[:, :H]
        z = rz[:, H:]
        n = jnp.tanh(gi[:, 2 * H:] + r * (gh[:, 2 * H:] + b_hh_n))
        h = (1.0 - z) * n + z * h
        out = jnp.where(lens_b == t, h, out)                  # latch h_t at t==lens[b]

    out_ref[...] = out


@jax.jit
def gru_transform_forward(feature, result_len, params):
    """feature: (B, T, I) f32 (batch_first, like the PyTorch module).
       result_len: (B,) int  ->  (B, H) f32 == the module's returned self.out."""
    B, T, I = feature.shape
    H = params["w_hh_t"].shape[0]

    # Pad batch to a multiple of 8 so every per-timestep slab of the input
    # projection is an aligned sublane-tile slice inside the kernel.
    Bp = ((B + 7) // 8) * 8
    feat = jnp.transpose(feature.astype(jnp.float32), (1, 0, 2))   # (T, B, I)
    feat = jnp.pad(feat, ((0, 0), (0, Bp - B), (0, 0)))
    feat_flat = feat.reshape(T * Bp, I)                            # (T*Bp, I)
    lens = jnp.pad(result_len.astype(jnp.int32), (0, Bp - B)).reshape(Bp, 1)

    vmem = pl.BlockSpec(memory_space=pltpu.MemorySpace.VMEM)
    out = pl.pallas_call(
        functools.partial(gru_gather_kernel, T=T),
        out_shape=jax.ShapeDtypeStruct((Bp, H), jnp.float32),
        in_specs=[vmem] * 6,
        out_specs=vmem,
    )(feat_flat, params["w_ih_t"], params["w_hh_t"],
      params["b_ih"], params["b_hh"], lens)

    # TODO(synk): for lowest end-to-end latency, have the caller hand features
    # time-major (T,B,Ip) already padded (dropping the transpose/pad fusion,
    # whose cost is comparable to the kernel) and consume the padded (Bp,H)
    # output downstream instead of slicing here.
    # TODO(synk): add a leading batch grid axis (dimension_semantics="parallel")
    # if B ever exceeds one MXU pass height, to use both TensorCores on v7x.
    return out[:B]


def gru_reference(feature, result_len, params):
    """Pure-JAX reference of the GRU forward + gather, using the same
    precision choice as the kernel (bf16 matmul inputs, f32 accumulation and
    gate math), for validation."""
    B, T, I = feature.shape
    H = params["w_hh_t"].shape[0]
    w_ih = params["w_ih_t"].astype(jnp.bfloat16)
    w_hh = params["w_hh_t"].astype(jnp.bfloat16)
    b_ih = params["b_ih"]
    b_hh = params["b_hh"]

    def step(h, x_t):
        gi = jnp.dot(x_t.astype(jnp.bfloat16), w_ih,
                     preferred_element_type=jnp.float32) + b_ih
        gh = jnp.dot(h.astype(jnp.bfloat16), w_hh,
                     preferred_element_type=jnp.float32) + b_hh
        r = jax.nn.sigmoid(gi[:, :H] + gh[:, :H])
        z = jax.nn.sigmoid(gi[:, H:2 * H] + gh[:, H:2 * H])
        n = jnp.tanh(gi[:, 2 * H:] + r * gh[:, 2 * H:])
        h_new = (1.0 - z) * n + z * h
        return h_new, h_new

    h0 = jnp.zeros((B, H), jnp.float32)
    _, outs = lax.scan(step, h0,
                       jnp.transpose(feature.astype(jnp.float32), (1, 0, 2)))
    outs = jnp.transpose(outs, (1, 0, 2))                  # (B, T, H)
    lens = result_len.astype(jnp.int32)
    lens = jnp.where(lens == 0, 1, lens) - 1
    return outs[jnp.arange(B), lens]


if __name__ == "__main__":
    B, T, I, H = 4, 15, 16, 32   # T=15 matches nn.Linear(15, 1) in the module

    key = jax.random.PRNGKey(0)
    k = jax.random.split(key, 8)

    # Deterministic synthetic params (xavier_normal with gain=1.414 for GRU
    # weights, uniform biases), stored transposed for the kernel.
    gain = 1.414
    std_ih = gain * (2.0 / (I + 3 * H)) ** 0.5
    std_hh = gain * (2.0 / (H + 3 * H)) ** 0.5
    params = dict(
        w_ih_t=(jax.random.normal(k[0], (I, 3 * H)) * std_ih).astype(jnp.float32),
        w_hh_t=(jax.random.normal(k[1], (H, 3 * H)) * std_hh).astype(jnp.float32),
        b_ih=(jax.random.uniform(k[2], (1, 3 * H), minval=-1.0, maxval=1.0)
              / (H ** 0.5)).astype(jnp.float32),
        b_hh=(jax.random.uniform(k[3], (1, 3 * H), minval=-1.0, maxval=1.0)
              / (H ** 0.5)).astype(jnp.float32),
    )

    feature = jax.random.normal(k[6], (B, T, I), dtype=jnp.float32)
    # Includes a 0 to exercise the clamp-to-1 path of the module.
    result_len = jnp.array([0, 3, 15, 7], dtype=jnp.int32)

    out = gru_transform_forward(feature, result_len, params)
    out = jax.block_until_ready(out)

    ref = gru_reference(feature, result_len, params)
    assert out.shape == (B, H)
    # Tolerance covers bf16 matmul-input rounding-order / bias-fold
    # associativity differences; real bugs (gate order, latch index) would
    # show up as O(0.1) errors.
    assert jnp.allclose(out, ref, atol=1e-3, rtol=1e-3), "mismatch vs JAX reference"

    print("KERNEL_OK")
</pallas_src>

<mosaic_0001>
module attributes {stable_mosaic.version = 11 : i64} {
  func.func @gru_gather_kernel(%arg0: memref<120x16xf32, #tpu.memory_space<vmem>>, %arg1: memref<16x96xf32, #tpu.memory_space<vmem>>, %arg2: memref<32x96xf32, #tpu.memory_space<vmem>>, %arg3: memref<1x96xf32, #tpu.memory_space<vmem>>, %arg4: memref<1x96xf32, #tpu.memory_space<vmem>>, %arg5: memref<8x1xi32, #tpu.memory_space<vmem>>, %arg6: memref<8x32xf32, #tpu.memory_space<vmem>>) attributes {dimension_semantics = [], scalar_prefetch = 0 : i64, scratch_operands = 0 : i64, tpu.core_type = #tpu.core_type<tc>} {
    %c0 = arith.constant 0 : index
    %c0_0 = arith.constant 0 : index
    %0 = vector.load %arg2[%c0, %c0_0] : memref<32x96xf32, #tpu.memory_space<vmem>>, vector<32x96xf32>
    %1 = arith.truncf %0 : vector<32x96xf32> to vector<32x96xbf16>
    %c0_1 = arith.constant 0 : index
    %c0_2 = arith.constant 0 : index
    %2 = vector.load %arg4[%c0_1, %c0_2] : memref<1x96xf32, #tpu.memory_space<vmem>>, vector<1x96xf32>
    %3 = vector.extract_strided_slice %2 {offsets = [0, 64], sizes = [1, 32], strides = [1, 1]} : vector<1x96xf32> to vector<1x32xf32>
    %4 = tpu.iota {dimensions = array<i32: 1>} : vector<1x96xi32>
    %c0_3 = arith.constant 0 : index
    %c0_4 = arith.constant 0 : index
    %5 = vector.load %arg3[%c0_3, %c0_4] : memref<1x96xf32, #tpu.memory_space<vmem>>, vector<1x96xf32>
    %c64_i32 = arith.constant 64 : i32
    %6 = vector.broadcast %c64_i32 : i32 to vector<1x96xi32>
    %7 = arith.cmpi slt, %4, %6 : vector<1x96xi32>
    %cst = arith.constant 0.000000e+00 : f32
    %8 = vector.broadcast %cst : f32 to vector<1x96xf32>
    %9 = arith.select %7, %2, %8 : vector<1x96xi1>, vector<1x96xf32>
    %10 = arith.addf %5, %9 : vector<1x96xf32>
    %c0_5 = arith.constant 0 : index
    %c0_6 = arith.constant 0 : index
    %11 = vector.load %arg0[%c0_5, %c0_6] : memref<120x16xf32, #tpu.memory_space<vmem>>, vector<120x16xf32>
    %12 = arith.truncf %11 : vector<120x16xf32> to vector<120x16xbf16>
    %c0_7 = arith.constant 0 : index
    %c0_8 = arith.constant 0 : index
    %13 = vector.load %arg1[%c0_7, %c0_8] : memref<16x96xf32, #tpu.memory_space<vmem>>, vector<16x96xf32>
    %14 = arith.truncf %13 : vector<16x96xf32> to vector<16x96xbf16>
    %cst_9 = arith.constant dense<0.000000e+00> : vector<120x96xf32>
    %15 = tpu.matmul %12, %14, %cst_9 {dimension_numbers = #tpu.dot_dimension_numbers<[1], [0], [0], [1], [0, 0, 1, 1], [], []>} : vector<120x16xbf16>, vector<16x96xbf16>, vector<120x96xf32> -> vector<120x96xf32>
    %16 = vector.broadcast %10 : vector<1x96xf32> to vector<120x96xf32>
    %17 = arith.addf %15, %16 : vector<120x96xf32>
    %c0_10 = arith.constant 0 : index
    %c0_11 = arith.constant 0 : index
    %18 = vector.load %arg5[%c0_10, %c0_11] : memref<8x1xi32, #tpu.memory_space<vmem>>, vector<8x1xi32>
    %c0_i32 = arith.constant 0 : i32
    %19 = vector.broadcast %c0_i32 : i32 to vector<8x1xi32>
    %20 = arith.cmpi eq, %18, %19 : vector<8x1xi32>
    %c1_i32 = arith.constant 1 : i32
    %21 = vector.broadcast %c1_i32 : i32 to vector<8x1xi32>
    %22 = arith.select %20, %21, %18 : vector<8x1xi1>, vector<8x1xi32>
    %c1_i32_12 = arith.constant 1 : i32
    %23 = vector.broadcast %c1_i32_12 : i32 to vector<8x1xi32>
    %24 = arith.subi %22, %23 : vector<8x1xi32>
    %25 = vector.shape_cast %24 : vector<8x1xi32> to vector<8x1xi32>
    %26 = vector.broadcast %25 : vector<8x1xi32> to vector<8x32xi32>
    %cst_13 = arith.constant 0.000000e+00 : f32
    %27 = vector.broadcast %cst_13 : f32 to vector<8x32xf32>
    %cst_14 = arith.constant 0.000000e+00 : f32
    %28 = vector.broadcast %cst_14 : f32 to vector<8x32xf32>
    %29 = vector.extract_strided_slice %17 {offsets = [0, 0], sizes = [8, 96], strides = [1, 1]} : vector<120x96xf32> to vector<8x96xf32>
    %30 = arith.truncf %27 : vector<8x32xf32> to vector<8x32xbf16>
    %cst_15 = arith.constant dense<0.000000e+00> : vector<8x96xf32>
    %31 = tpu.matmul %30, %1, %cst_15 {dimension_numbers = #tpu.dot_dimension_numbers<[1], [0], [0], [1], [0, 0, 1, 1], [], []>} : vector<8x32xbf16>, vector<32x96xbf16>, vector<8x96xf32> -> vector<8x96xf32>
    %32 = vector.extract_strided_slice %29 {offsets = [0, 0], sizes = [8, 64], strides = [1, 1]} : vector<8x96xf32> to vector<8x64xf32>
    %33 = vector.extract_strided_slice %31 {offsets = [0, 0], sizes = [8, 64], strides = [1, 1]} : vector<8x96xf32> to vector<8x64xf32>
    %34 = arith.addf %32, %33 : vector<8x64xf32>
    %35 = arith.negf %34 : vector<8x64xf32>
    %36 = math.exp %35 : vector<8x64xf32>
    %cst_16 = arith.constant 1.000000e+00 : f32
    %37 = vector.broadcast %cst_16 : f32 to vector<8x64xf32>
    %38 = arith.addf %37, %36 : vector<8x64xf32>
    %39 = arith.divf %37, %38 : vector<8x64xf32>
    %40 = vector.extract_strided_slice %39 {offsets = [0, 0], sizes = [8, 32], strides = [1, 1]} : vector<8x64xf32> to vector<8x32xf32>
    %41 = vector.extract_strided_slice %39 {offsets = [0, 32], sizes = [8, 32], strides = [1, 1]} : vector<8x64xf32> to vector<8x32xf32>
    %42 = vector.extract_strided_slice %29 {offsets = [0, 64], sizes = [8, 32], strides = [1, 1]} : vector<8x96xf32> to vector<8x32xf32>
    %43 = vector.extract_strided_slice %31 {offsets = [0, 64], sizes = [8, 32], strides = [1, 1]} : vector<8x96xf32> to vector<8x32xf32>
    %44 = vector.broadcast %3 : vector<1x32xf32> to vector<8x32xf32>
    %45 = arith.addf %43, %44 : vector<8x32xf32>
    %46 = arith.mulf %40, %45 : vector<8x32xf32>
    %47 = arith.addf %42, %46 : vector<8x32xf32>
    %48 = math.tanh %47 : vector<8x32xf32>
    %cst_17 = arith.constant 1.000000e+00 : f32
    %49 = vector.broadcast %cst_17 : f32 to vector<8x32xf32>
    %50 = arith.subf %49, %41 : vector<8x32xf32>
    %51 = arith.mulf %50, %48 : vector<8x32xf32>
    %52 = arith.mulf %41, %27 : vector<8x32xf32>
    %53 = arith.addf %51, %52 : vector<8x32xf32>
    %c0_i32_18 = arith.constant 0 : i32
    %54 = vector.broadcast %c0_i32_18 : i32 to vector<8x32xi32>
    %55 = arith.cmpi eq, %26, %54 : vector<8x32xi32>
    %56 = arith.select %55, %53, %28 : vector<8x32xi1>, vector<8x32xf32>
    %57 = vector.extract_strided_slice %17 {offsets = [8, 0], sizes = [8, 96], strides = [1, 1]} : vector<120x96xf32> to vector<8x96xf32>
    %58 = arith.truncf %53 : vector<8x32xf32> to vector<8x32xbf16>
    %cst_19 = arith.constant dense<0.000000e+00> : vector<8x96xf32>
    %59 = tpu.matmul %58, %1, %cst_19 {dimension_numbers = #tpu.dot_dimension_numbers<[1], [0], [0], [1], [0, 0, 1, 1], [], []>} : vector<8x32xbf16>, vector<32x96xbf16>, vector<8x96xf32> -> vector<8x96xf32>
    %60 = vector.extract_strided_slice %57 {offsets = [0, 0], sizes = [8, 64], strides = [1, 1]} : vector<8x96xf32> to vector<8x64xf32>
    %61 = vector.extract_strided_slice %59 {offsets = [0, 0], sizes = [8, 64], strides = [1, 1]} : vector<8x96xf32> to vector<8x64xf32>
    %62 = arith.addf %60, %61 : vector<8x64xf32>
    %63 = arith.negf %62 : vector<8x64xf32>
    %64 = math.exp %63 : vector<8x64xf32>
    %cst_20 = arith.constant 1.000000e+00 : f32
    %65 = vector.broadcast %cst_20 : f32 to vector<8x64xf32>
    %66 = arith.addf %65, %64 : vector<8x64xf32>
    %67 = arith.divf %65, %66 : vector<8x64xf32>
    %68 = vector.extract_strided_slice %67 {offsets = [0, 0], sizes = [8, 32], strides = [1, 1]} : vector<8x64xf32> to vector<8x32xf32>
    %69 = vector.extract_strided_slice %67 {offsets = [0, 32], sizes = [8, 32], strides = [1, 1]} : vector<8x64xf32> to vector<8x32xf32>
    %70 = vector.extract_strided_slice %57 {offsets = [0, 64], sizes = [8, 32], strides = [1, 1]} : vector<8x96xf32> to vector<8x32xf32>
    %71 = vector.extract_strided_slice %59 {offsets = [0, 64], sizes = [8, 32], strides = [1, 1]} : vector<8x96xf32> to vector<8x32xf32>
    %72 = vector.broadcast %3 : vector<1x32xf32> to vector<8x32xf32>
    %73 = arith.addf %71, %72 : vector<8x32xf32>
    %74 = arith.mulf %68, %73 : vector<8x32xf32>
    %75 = arith.addf %70, %74 : vector<8x32xf32>
    %76 = math.tanh %75 : vector<8x32xf32>
    %cst_21 = arith.constant 1.000000e+00 : f32
    %77 = vector.broadcast %cst_21 : f32 to vector<8x32xf32>
    %78 = arith.subf %77, %69 : vector<8x32xf32>
    %79 = arith.mulf %78, %76 : vector<8x32xf32>
    %80 = arith.mulf %69, %53 : vector<8x32xf32>
    %81 = arith.addf %79, %80 : vector<8x32xf32>
    %c1_i32_22 = arith.constant 1 : i32
    %82 = vector.broadcast %c1_i32_22 : i32 to vector<8x32xi32>
    %83 = arith.cmpi eq, %26, %82 : vector<8x32xi32>
    %84 = arith.select %83, %81, %56 : vector<8x32xi1>, vector<8x32xf32>
    %85 = vector.extract_strided_slice %17 {offsets = [16, 0], sizes = [8, 96], strides = [1, 1]} : vector<120x96xf32> to vector<8x96xf32>
    %86 = arith.truncf %81 : vector<8x32xf32> to vector<8x32xbf16>
    %cst_23 = arith.constant dense<0.000000e+00> : vector<8x96xf32>
    %87 = tpu.matmul %86, %1, %cst_23 {dimension_numbers = #tpu.dot_dimension_numbers<[1], [0], [0], [1], [0, 0, 1, 1], [], []>} : vector<8x32xbf16>, vector<32x96xbf16>, vector<8x96xf32> -> vector<8x96xf32>
    %88 = vector.extract_strided_slice %85 {offsets = [0, 0], sizes = [8, 64], strides = [1, 1]} : vector<8x96xf32> to vector<8x64xf32>
    %89 = vector.extract_strided_slice %87 {offsets = [0, 0], sizes = [8, 64], strides = [1, 1]} : vector<8x96xf32> to vector<8x64xf32>
    %90 = arith.addf %88, %89 : vector<8x64xf32>
    %91 = arith.negf %90 : vector<8x64xf32>
    %92 = math.exp %91 : vector<8x64xf32>
    %cst_24 = arith.constant 1.000000e+00 : f32
    %93 = vector.broadcast %cst_24 : f32 to vector<8x64xf32>
    %94 = arith.addf %93, %92 : vector<8x64xf32>
    %95 = arith.divf %93, %94 : vector<8x64xf32>
    %96 = vector.extract_strided_slice %95 {offsets = [0, 0], sizes = [8, 32], strides = [1, 1]} : vector<8x64xf32> to vector<8x32xf32>
    %97 = vector.extract_strided_slice %95 {offsets = [0, 32], sizes = [8, 32], strides = [1, 1]} : vector<8x64xf32> to vector<8x32xf32>
    %98 = vector.extract_strided_slice %85 {offsets = [0, 64], sizes = [8, 32], strides = [1, 1]} : vector<8x96xf32> to vector<8x32xf32>
    %99 = vector.extract_strided_slice %87 {offsets = [0, 64], sizes = [8, 32], strides = [1, 1]} : vector<8x96xf32> to vector<8x32xf32>
    %100 = vector.broadcast %3 : vector<1x32xf32> to vector<8x32xf32>
    %101 = arith.addf %99, %100 : vector<8x32xf32>
    %102 = arith.mulf %96, %101 : vector<8x32xf32>
    %103 = arith.addf %98, %102 : vector<8x32xf32>
    %104 = math.tanh %103 : vector<8x32xf32>
    %cst_25 = arith.constant 1.000000e+00 : f32
    %105 = vector.broadcast %cst_25 : f32 to vector<8x32xf32>
    %106 = arith.subf %105, %97 : vector<8x32xf32>
    %107 = arith.mulf %106, %104 : vector<8x32xf32>
    %108 = arith.mulf %97, %81 : vector<8x32xf32>
    %109 = arith.addf %107, %108 : vector<8x32xf32>
    %c2_i32 = arith.constant 2 : i32
    %110 = vector.broadcast %c2_i32 : i32 to vector<8x32xi32>
    %111 = arith.cmpi eq, %26, %110 : vector<8x32xi32>
    %112 = arith.select %111, %109, %84 : vector<8x32xi1>, vector<8x32xf32>
    %113 = vector.extract_strided_slice %17 {offsets = [24, 0], sizes = [8, 96], strides = [1, 1]} : vector<120x96xf32> to vector<8x96xf32>
    %114 = arith.truncf %109 : vector<8x32xf32> to vector<8x32xbf16>
    %cst_26 = arith.constant dense<0.000000e+00> : vector<8x96xf32>
    %115 = tpu.matmul %114, %1, %cst_26 {dimension_numbers = #tpu.dot_dimension_numbers<[1], [0], [0], [1], [0, 0, 1, 1], [], []>} : vector<8x32xbf16>, vector<32x96xbf16>, vector<8x96xf32> -> vector<8x96xf32>
    %116 = vector.extract_strided_slice %113 {offsets = [0, 0], sizes = [8, 64], strides = [1, 1]} : vector<8x96xf32> to vector<8x64xf32>
    %117 = vector.extract_strided_slice %115 {offsets = [0, 0], sizes = [8, 64], strides = [1, 1]} : vector<8x96xf32> to vector<8x64xf32>
    %118 = arith.addf %116, %117 : vector<8x64xf32>
    %119 = arith.negf %118 : vector<8x64xf32>
    %120 = math.exp %119 : vector<8x64xf32>
    %cst_27 = arith.constant 1.000000e+00 : f32
    %121 = vector.broadcast %cst_27 : f32 to vector<8x64xf32>
    %122 = arith.addf %121, %120 : vector<8x64xf32>
    %123 = arith.divf %121, %122 : vector<8x64xf32>
    %124 = vector.extract_strided_slice %123 {offsets = [0, 0], sizes = [8, 32], strides = [1, 1]} : vector<8x64xf32> to vector<8x32xf32>
    %125 = vector.extract_strided_slice %123 {offsets = [0, 32], sizes = [8, 32], strides = [1, 1]} : vector<8x64xf32> to vector<8x32xf32>
    %126 = vector.extract_strided_slice %113 {offsets = [0, 64], sizes = [8, 32], strides = [1, 1]} : vector<8x96xf32> to vector<8x32xf32>
    %127 = vector.extract_strided_slice %115 {offsets = [0, 64], sizes = [8, 32], strides = [1, 1]} : vector<8x96xf32> to vector<8x32xf32>
    %128 = vector.broadcast %3 : vector<1x32xf32> to vector<8x32xf32>
    %129 = arith.addf %127, %128 : vector<8x32xf32>
    %130 = arith.mulf %124, %129 : vector<8x32xf32>
    %131 = arith.addf %126, %130 : vector<8x32xf32>
    %132 = math.tanh %131 : vector<8x32xf32>
    %cst_28 = arith.constant 1.000000e+00 : f32
    %133 = vector.broadcast %cst_28 : f32 to vector<8x32xf32>
    %134 = arith.subf %133, %125 : vector<8x32xf32>
    %135 = arith.mulf %134, %132 : vector<8x32xf32>
    %136 = arith.mulf %125, %109 : vector<8x32xf32>
    %137 = arith.addf %135, %136 : vector<8x32xf32>
    %c3_i32 = arith.constant 3 : i32
    %138 = vector.broadcast %c3_i32 : i32 to vector<8x32xi32>
    %139 = arith.cmpi eq, %26, %138 : vector<8x32xi32>
    %140 = arith.select %139, %137, %112 : vector<8x32xi1>, vector<8x32xf32>
    %141 = vector.extract_strided_slice %17 {offsets = [32, 0], sizes = [8, 96], strides = [1, 1]} : vector<120x96xf32> to vector<8x96xf32>
    %142 = arith.truncf %137 : vector<8x32xf32> to vector<8x32xbf16>
    %cst_29 = arith.constant dense<0.000000e+00> : vector<8x96xf32>
    %143 = tpu.matmul %142, %1, %cst_29 {dimension_numbers = #tpu.dot_dimension_numbers<[1], [0], [0], [1], [0, 0, 1, 1], [], []>} : vector<8x32xbf16>, vector<32x96xbf16>, vector<8x96xf32> -> vector<8x96xf32>
    %144 = vector.extract_strided_slice %141 {offsets = [0, 0], sizes = [8, 64], strides = [1, 1]} : vector<8x96xf32> to vector<8x64xf32>
    %145 = vector.extract_strided_slice %143 {offsets = [0, 0], sizes = [8, 64], strides = [1, 1]} : vector<8x96xf32> to vector<8x64xf32>
    %146 = arith.addf %144, %145 : vector<8x64xf32>
    %147 = arith.negf %146 : vector<8x64xf32>
    %148 = math.exp %147 : vector<8x64xf32>
    %cst_30 = arith.constant 1.000000e+00 : f32
    %149 = vector.broadcast %cst_30 : f32 to vector<8x64xf32>
    %150 = arith.addf %149, %148 : vector<8x64xf32>
    %151 = arith.divf %149, %150 : vector<8x64xf32>
    %152 = vector.extract_strided_slice %151 {offsets = [0, 0], sizes = [8, 32], strides = [1, 1]} : vector<8x64xf32> to vector<8x32xf32>
    %153 = vector.extract_strided_slice %151 {offsets = [0, 32], sizes = [8, 32], strides = [1, 1]} : vector<8x64xf32> to vector<8x32xf32>
    %154 = vector.extract_strided_slice %141 {offsets = [0, 64], sizes = [8, 32], strides = [1, 1]} : vector<8x96xf32> to vector<8x32xf32>
    %155 = vector.extract_strided_slice %143 {offsets = [0, 64], sizes = [8, 32], strides = [1, 1]} : vector<8x96xf32> to vector<8x32xf32>
    %156 = vector.broadcast %3 : vector<1x32xf32> to vector<8x32xf32>
    %157 = arith.addf %155, %156 : vector<8x32xf32>
    %158 = arith.mulf %152, %157 : vector<8x32xf32>
    %159 = arith.addf %154, %158 : vector<8x32xf32>
    %160 = math.tanh %159 : vector<8x32xf32>
    %cst_31 = arith.constant 1.000000e+00 : f32
    %161 = vector.broadcast %cst_31 : f32 to vector<8x32xf32>
    %162 = arith.subf %161, %153 : vector<8x32xf32>
    %163 = arith.mulf %162, %160 : vector<8x32xf32>
    %164 = arith.mulf %153, %137 : vector<8x32xf32>
    %165 = arith.addf %163, %164 : vector<8x32xf32>
    %c4_i32 = arith.constant 4 : i32
    %166 = vector.broadcast %c4_i32 : i32 to vector<8x32xi32>
    %167 = arith.cmpi eq, %26, %166 : vector<8x32xi32>
    %168 = arith.select %167, %165, %140 : vector<8x32xi1>, vector<8x32xf32>
    %169 = vector.extract_strided_slice %17 {offsets = [40, 0], sizes = [8, 96], strides = [1, 1]} : vector<120x96xf32> to vector<8x96xf32>
    %170 = arith.truncf %165 : vector<8x32xf32> to vector<8x32xbf16>
    %cst_32 = arith.constant dense<0.000000e+00> : vector<8x96xf32>
    %171 = tpu.matmul %170, %1, %cst_32 {dimension_numbers = #tpu.dot_dimension_numbers<[1], [0], [0], [1], [0, 0, 1, 1], [], []>} : vector<8x32xbf16>, vector<32x96xbf16>, vector<8x96xf32> -> vector<8x96xf32>
    %172 = vector.extract_strided_slice %169 {offsets = [0, 0], sizes = [8, 64], strides = [1, 1]} : vector<8x96xf32> to vector<8x64xf32>
    %173 = vector.extract_strided_slice %171 {offsets = [0, 0], sizes = [8, 64], strides = [1, 1]} : vector<8x96xf32> to vector<8x64xf32>
    %174 = arith.addf %172, %173 : vector<8x64xf32>
    %175 = arith.negf %174 : vector<8x64xf32>
    %176 = math.exp %175 : vector<8x64xf32>
    %cst_33 = arith.constant 1.000000e+00 : f32
    %177 = vector.broadcast %cst_33 : f32 to vector<8x64xf32>
    %178 = arith.addf %177, %176 : vector<8x64xf32>
    %179 = arith.divf %177, %178 : vector<8x64xf32>
    %180 = vector.extract_strided_slice %179 {offsets = [0, 0], sizes = [8, 32], strides = [1, 1]} : vector<8x64xf32> to vector<8x32xf32>
    %181 = vector.extract_strided_slice %179 {offsets = [0, 32], sizes = [8, 32], strides = [1, 1]} : vector<8x64xf32> to vector<8x32xf32>
    %182 = vector.extract_strided_slice %169 {offsets = [0, 64], sizes = [8, 32], strides = [1, 1]} : vector<8x96xf32> to vector<8x32xf32>
    %183 = vector.extract_strided_slice %171 {offsets = [0, 64], sizes = [8, 32], strides = [1, 1]} : vector<8x96xf32> to vector<8x32xf32>
    %184 = vector.broadcast %3 : vector<1x32xf32> to vector<8x32xf32>
    %185 = arith.addf %183, %184 : vector<8x32xf32>
    %186 = arith.mulf %180, %185 : vector<8x32xf32>
    %187 = arith.addf %182, %186 : vector<8x32xf32>
    %188 = math.tanh %187 : vector<8x32xf32>
    %cst_34 = arith.constant 1.000000e+00 : f32
    %189 = vector.broadcast %cst_34 : f32 to vector<8x32xf32>
    %190 = arith.subf %189, %181 : vector<8x32xf32>
    %191 = arith.mulf %190, %188 : vector<8x32xf32>
    %192 = arith.mulf %181, %165 : vector<8x32xf32>
    %193 = arith.addf %191, %192 : vector<8x32xf32>
    %c5_i32 = arith.constant 5 : i32
    %194 = vector.broadcast %c5_i32 : i32 to vector<8x32xi32>
    %195 = arith.cmpi eq, %26, %194 : vector<8x32xi32>
    %196 = arith.select %195, %193, %168 : vector<8x32xi1>, vector<8x32xf32>
    %197 = vector.extract_strided_slice %17 {offsets = [48, 0], sizes = [8, 96], strides = [1, 1]} : vector<120x96xf32> to vector<8x96xf32>
    %198 = arith.truncf %193 : vector<8x32xf32> to vector<8x32xbf16>
    %cst_35 = arith.constant dense<0.000000e+00> : vector<8x96xf32>
    %199 = tpu.matmul %198, %1, %cst_35 {dimension_numbers = #tpu.dot_dimension_numbers<[1], [0], [0], [1], [0, 0, 1, 1], [], []>} : vector<8x32xbf16>, vector<32x96xbf16>, vector<8x96xf32> -> vector<8x96xf32>
    %200 = vector.extract_strided_slice %197 {offsets = [0, 0], sizes = [8, 64], strides = [1, 1]} : vector<8x96xf32> to vector<8x64xf32>
    %201 = vector.extract_strided_slice %199 {offsets = [0, 0], sizes = [8, 64], strides = [1, 1]} : vector<8x96xf32> to vector<8x64xf32>
    %202 = arith.addf %200, %201 : vector<8x64xf32>
    %203 = arith.negf %202 : vector<8x64xf32>
    %204 = math.exp %203 : vector<8x64xf32>
    %cst_36 = arith.constant 1.000000e+00 : f32
    %205 = vector.broadcast %cst_36 : f32 to vector<8x64xf32>
    %206 = arith.addf %205, %204 : vector<8x64xf32>
    %207 = arith.divf %205, %206 : vector<8x64xf32>
    %208 = vector.extract_strided_slice %207 {offsets = [0, 0], sizes = [8, 32], strides = [1, 1]} : vector<8x64xf32> to vector<8x32xf32>
    %209 = vector.extract_strided_slice %207 {offsets = [0, 32], sizes = [8, 32], strides = [1, 1]} : vector<8x64xf32> to vector<8x32xf32>
    %210 = vector.extract_strided_slice %197 {offsets = [0, 64], sizes = [8, 32], strides = [1, 1]} : vector<8x96xf32> to vector<8x32xf32>
    %211 = vector.extract_strided_slice %199 {offsets = [0, 64], sizes = [8, 32], strides = [1, 1]} : vector<8x96xf32> to vector<8x32xf32>
    %212 = vector.broadcast %3 : vector<1x32xf32> to vector<8x32xf32>
    %213 = arith.addf %211, %212 : vector<8x32xf32>
    %214 = arith.mulf %208, %213 : vector<8x32xf32>
    %215 = arith.addf %210, %214 : vector<8x32xf32>
    %216 = math.tanh %215 : vector<8x32xf32>
    %cst_37 = arith.constant 1.000000e+00 : f32
    %217 = vector.broadcast %cst_37 : f32 to vector<8x32xf32>
    %218 = arith.subf %217, %209 : vector<8x32xf32>
    %219 = arith.mulf %218, %216 : vector<8x32xf32>
    %220 = arith.mulf %209, %193 : vector<8x32xf32>
    %221 = arith.addf %219, %220 : vector<8x32xf32>
    %c6_i32 = arith.constant 6 : i32
    %222 = vector.broadcast %c6_i32 : i32 to vector<8x32xi32>
    %223 = arith.cmpi eq, %26, %222 : vector<8x32xi32>
    %224 = arith.select %223, %221, %196 : vector<8x32xi1>, vector<8x32xf32>
    %225 = vector.extract_strided_slice %17 {offsets = [56, 0], sizes = [8, 96], strides = [1, 1]} : vector<120x96xf32> to vector<8x96xf32>
    %226 = arith.truncf %221 : vector<8x32xf32> to vector<8x32xbf16>
    %cst_38 = arith.constant dense<0.000000e+00> : vector<8x96xf32>
    %227 = tpu.matmul %226, %1, %cst_38 {dimension_numbers = #tpu.dot_dimension_numbers<[1], [0], [0], [1], [0, 0, 1, 1], [], []>} : vector<8x32xbf16>, vector<32x96xbf16>, vector<8x96xf32> -> vector<8x96xf32>
    %228 = vector.extract_strided_slice %225 {offsets = [0, 0], sizes = [8, 64], strides = [1, 1]} : vector<8x96xf32> to vector<8x64xf32>
    %229 = vector.extract_strided_slice %227 {offsets = [0, 0], sizes = [8, 64], strides = [1, 1]} : vector<8x96xf32> to vector<8x64xf32>
    %230 = arith.addf %228, %229 : vector<8x64xf32>
    %231 = arith.negf %230 : vector<8x64xf32>
    %232 = math.exp %231 : vector<8x64xf32>
    %cst_39 = arith.constant 1.000000e+00 : f32
    %233 = vector.broadcast %cst_39 : f32 to vector<8x64xf32>
    %234 = arith.addf %233, %232 : vector<8x64xf32>
    %235 = arith.divf %233, %234 : vector<8x64xf32>
    %236 = vector.extract_strided_slice %235 {offsets = [0, 0], sizes = [8, 32], strides = [1, 1]} : vector<8x64xf32> to vector<8x32xf32>
    %237 = vector.extract_strided_slice %235 {offsets = [0, 32], sizes = [8, 32], strides = [1, 1]} : vector<8x64xf32> to vector<8x32xf32>
    %238 = vector.extract_strided_slice %225 {offsets = [0, 64], sizes = [8, 32], strides = [1, 1]} : vector<8x96xf32> to vector<8x32xf32>
    %239 = vector.extract_strided_slice %227 {offsets = [0, 64], sizes = [8, 32], strides = [1, 1]} : vector<8x96xf32> to vector<8x32xf32>
    %240 = vector.broadcast %3 : vector<1x32xf32> to vector<8x32xf32>
    %241 = arith.addf %239, %240 : vector<8x32xf32>
    %242 = arith.mulf %236, %241 : vector<8x32xf32>
    %243 = arith.addf %238, %242 : vector<8x32xf32>
    %244 = math.tanh %243 : vector<8x32xf32>
    %cst_40 = arith.constant 1.000000e+00 : f32
    %245 = vector.broadcast %cst_40 : f32 to vector<8x32xf32>
    %246 = arith.subf %245, %237 : vector<8x32xf32>
    %247 = arith.mulf %246, %244 : vector<8x32xf32>
    %248 = arith.mulf %237, %221 : vector<8x32xf32>
    %249 = arith.addf %247, %248 : vector<8x32xf32>
    %c7_i32 = arith.constant 7 : i32
    %250 = vector.broadcast %c7_i32 : i32 to vector<8x32xi32>
    %251 = arith.cmpi eq, %26, %250 : vector<8x32xi32>
    %252 = arith.select %251, %249, %224 : vector<8x32xi1>, vector<8x32xf32>
    %253 = vector.extract_strided_slice %17 {offsets = [64, 0], sizes = [8, 96], strides = [1, 1]} : vector<120x96xf32> to vector<8x96xf32>
    %254 = arith.truncf %249 : vector<8x32xf32> to vector<8x32xbf16>
    %cst_41 = arith.constant dense<0.000000e+00> : vector<8x96xf32>
    %255 = tpu.matmul %254, %1, %cst_41 {dimension_numbers = #tpu.dot_dimension_numbers<[1], [0], [0], [1], [0, 0, 1, 1], [], []>} : vector<8x32xbf16>, vector<32x96xbf16>, vector<8x96xf32> -> vector<8x96xf32>
    %256 = vector.extract_strided_slice %253 {offsets = [0, 0], sizes = [8, 64], strides = [1, 1]} : vector<8x96xf32> to vector<8x64xf32>
    %257 = vector.extract_strided_slice %255 {offsets = [0, 0], sizes = [8, 64], strides = [1, 1]} : vector<8x96xf32> to vector<8x64xf32>
    %258 = arith.addf %256, %257 : vector<8x64xf32>
    %259 = arith.negf %258 : vector<8x64xf32>
    %260 = math.exp %259 : vector<8x64xf32>
    %cst_42 = arith.constant 1.000000e+00 : f32
    %261 = vector.broadcast %cst_42 : f32 to vector<8x64xf32>
    %262 = arith.addf %261, %260 : vector<8x64xf32>
    %263 = arith.divf %261, %262 : vector<8x64xf32>
    %264 = vector.extract_strided_slice %263 {offsets = [0, 0], sizes = [8, 32], strides = [1, 1]} : vector<8x64xf32> to vector<8x32xf32>
    %265 = vector.extract_strided_slice %263 {offsets = [0, 32], sizes = [8, 32], strides = [1, 1]} : vector<8x64xf32> to vector<8x32xf32>
    %266 = vector.extract_strided_slice %253 {offsets = [0, 64], sizes = [8, 32], strides = [1, 1]} : vector<8x96xf32> to vector<8x32xf32>
    %267 = vector.extract_strided_slice %255 {offsets = [0, 64], sizes = [8, 32], strides = [1, 1]} : vector<8x96xf32> to vector<8x32xf32>
    %268 = vector.broadcast %3 : vector<1x32xf32> to vector<8x32xf32>
    %269 = arith.addf %267, %268 : vector<8x32xf32>
    %270 = arith.mulf %264, %269 : vector<8x32xf32>
    %271 = arith.addf %266, %270 : vector<8x32xf32>
    %272 = math.tanh %271 : vector<8x32xf32>
    %cst_43 = arith.constant 1.000000e+00 : f32
    %273 = vector.broadcast %cst_43 : f32 to vector<8x32xf32>
    %274 = arith.subf %273, %265 : vector<8x32xf32>
    %275 = arith.mulf %274, %272 : vector<8x32xf32>
    %276 = arith.mulf %265, %249 : vector<8x32xf32>
    %277 = arith.addf %275, %276 : vector<8x32xf32>
    %c8_i32 = arith.constant 8 : i32
    %278 = vector.broadcast %c8_i32 : i32 to vector<8x32xi32>
    %279 = arith.cmpi eq, %26, %278 : vector<8x32xi32>
    %280 = arith.select %279, %277, %252 : vector<8x32xi1>, vector<8x32xf32>
    %281 = vector.extract_strided_slice %17 {offsets = [72, 0], sizes = [8, 96], strides = [1, 1]} : vector<120x96xf32> to vector<8x96xf32>
    %282 = arith.truncf %277 : vector<8x32xf32> to vector<8x32xbf16>
    %cst_44 = arith.constant dense<0.000000e+00> : vector<8x96xf32>
    %283 = tpu.matmul %282, %1, %cst_44 {dimension_numbers = #tpu.dot_dimension_numbers<[1], [0], [0], [1], [0, 0, 1, 1], [], []>} : vector<8x32xbf16>, vector<32x96xbf16>, vector<8x96xf32> -> vector<8x96xf32>
    %284 = vector.extract_strided_slice %281 {offsets = [0, 0], sizes = [8, 64], strides = [1, 1]} : vector<8x96xf32> to vector<8x64xf32>
    %285 = vector.extract_strided_slice %283 {offsets = [0, 0], sizes = [8, 64], strides = [1, 1]} : vector<8x96xf32> to vector<8x64xf32>
    %286 = arith.addf %284, %285 : vector<8x64xf32>
    %287 = arith.negf %286 : vector<8x64xf32>
    %288 = math.exp %287 : vector<8x64xf32>
    %cst_45 = arith.constant 1.000000e+00 : f32
    %289 = vector.broadcast %cst_45 : f32 to vector<8x64xf32>
    %290 = arith.addf %289, %288 : vector<8x64xf32>
    %291 = arith.divf %289, %290 : vector<8x64xf32>
    %292 = vector.extract_strided_slice %291 {offsets = [0, 0], sizes = [8, 32], strides = [1, 1]} : vector<8x64xf32> to vector<8x32xf32>
    %293 = vector.extract_strided_slice %291 {offsets = [0, 32], sizes = [8, 32], strides = [1, 1]} : vector<8x64xf32> to vector<8x32xf32>
    %294 = vector.extract_strided_slice %281 {offsets = [0, 64], sizes = [8, 32], strides = [1, 1]} : vector<8x96xf32> to vector<8x32xf32>
    %295 = vector.extract_strided_slice %283 {offsets = [0, 64], sizes = [8, 32], strides = [1, 1]} : vector<8x96xf32> to vector<8x32xf32>
    %296 = vector.broadcast %3 : vector<1x32xf32> to vector<8x32xf32>
    %297 = arith.addf %295, %296 : vector<8x32xf32>
    %298 = arith.mulf %292, %297 : vector<8x32xf32>
    %299 = arith.addf %294, %298 : vector<8x32xf32>
    %300 = math.tanh %299 : vector<8x32xf32>
    %cst_46 = arith.constant 1.000000e+00 : f32
    %301 = vector.broadcast %cst_46 : f32 to vector<8x32xf32>
    %302 = arith.subf %301, %293 : vector<8x32xf32>
    %303 = arith.mulf %302, %300 : vector<8x32xf32>
    %304 = arith.mulf %293, %277 : vector<8x32xf32>
    %305 = arith.addf %303, %304 : vector<8x32xf32>
    %c9_i32 = arith.constant 9 : i32
    %306 = vector.broadcast %c9_i32 : i32 to vector<8x32xi32>
    %307 = arith.cmpi eq, %26, %306 : vector<8x32xi32>
    %308 = arith.select %307, %305, %280 : vector<8x32xi1>, vector<8x32xf32>
    %309 = vector.extract_strided_slice %17 {offsets = [80, 0], sizes = [8, 96], strides = [1, 1]} : vector<120x96xf32> to vector<8x96xf32>
    %310 = arith.truncf %305 : vector<8x32xf32> to vector<8x32xbf16>
    %cst_47 = arith.constant dense<0.000000e+00> : vector<8x96xf32>
    %311 = tpu.matmul %310, %1, %cst_47 {dimension_numbers = #tpu.dot_dimension_numbers<[1], [0], [0], [1], [0, 0, 1, 1], [], []>} : vector<8x32xbf16>, vector<32x96xbf16>, vector<8x96xf32> -> vector<8x96xf32>
    %312 = vector.extract_strided_slice %309 {offsets = [0, 0], sizes = [8, 64], strides = [1, 1]} : vector<8x96xf32> to vector<8x64xf32>
    %313 = vector.extract_strided_slice %311 {offsets = [0, 0], sizes = [8, 64], strides = [1, 1]} : vector<8x96xf32> to vector<8x64xf32>
    %314 = arith.addf %312, %313 : vector<8x64xf32>
    %315 = arith.negf %314 : vector<8x64xf32>
    %316 = math.exp %315 : vector<8x64xf32>
    %cst_48 = arith.constant 1.000000e+00 : f32
    %317 = vector.broadcast %cst_48 : f32 to vector<8x64xf32>
    %318 = arith.addf %317, %316 : vector<8x64xf32>
    %319 = arith.divf %317, %318 : vector<8x64xf32>
    %320 = vector.extract_strided_slice %319 {offsets = [0, 0], sizes = [8, 32], strides = [1, 1]} : vector<8x64xf32> to vector<8x32xf32>
    %321 = vector.extract_strided_slice %319 {offsets = [0, 32], sizes = [8, 32], strides = [1, 1]} : vector<8x64xf32> to vector<8x32xf32>
    %322 = vector.extract_strided_slice %309 {offsets = [0, 64], sizes = [8, 32], strides = [1, 1]} : vector<8x96xf32> to vector<8x32xf32>
    %323 = vector.extract_strided_slice %311 {offsets = [0, 64], sizes = [8, 32], strides = [1, 1]} : vector<8x96xf32> to vector<8x32xf32>
    %324 = vector.broadcast %3 : vector<1x32xf32> to vector<8x32xf32>
    %325 = arith.addf %323, %324 : vector<8x32xf32>
    %326 = arith.mulf %320, %325 : vector<8x32xf32>
    %327 = arith.addf %322, %326 : vector<8x32xf32>
    %328 = math.tanh %327 : vector<8x32xf32>
    %cst_49 = arith.constant 1.000000e+00 : f32
    %329 = vector.broadcast %cst_49 : f32 to vector<8x32xf32>
    %330 = arith.subf %329, %321 : vector<8x32xf32>
    %331 = arith.mulf %330, %328 : vector<8x32xf32>
    %332 = arith.mulf %321, %305 : vector<8x32xf32>
    %333 = arith.addf %331, %332 : vector<8x32xf32>
    %c10_i32 = arith.constant 10 : i32
    %334 = vector.broadcast %c10_i32 : i32 to vector<8x32xi32>
    %335 = arith.cmpi eq, %26, %334 : vector<8x32xi32>
    %336 = arith.select %335, %333, %308 : vector<8x32xi1>, vector<8x32xf32>
    %337 = vector.extract_strided_slice %17 {offsets = [88, 0], sizes = [8, 96], strides = [1, 1]} : vector<120x96xf32> to vector<8x96xf32>
    %338 = arith.truncf %333 : vector<8x32xf32> to vector<8x32xbf16>
    %cst_50 = arith.constant dense<0.000000e+00> : vector<8x96xf32>
    %339 = tpu.matmul %338, %1, %cst_50 {dimension_numbers = #tpu.dot_dimension_numbers<[1], [0], [0], [1], [0, 0, 1, 1], [], []>} : vector<8x32xbf16>, vector<32x96xbf16>, vector<8x96xf32> -> vector<8x96xf32>
    %340 = vector.extract_strided_slice %337 {offsets = [0, 0], sizes = [8, 64], strides = [1, 1]} : vector<8x96xf32> to vector<8x64xf32>
    %341 = vector.extract_strided_slice %339 {offsets = [0, 0], sizes = [8, 64], strides = [1, 1]} : vector<8x96xf32> to vector<8x64xf32>
    %342 = arith.addf %340, %341 : vector<8x64xf32>
    %343 = arith.negf %342 : vector<8x64xf32>
    %344 = math.exp %343 : vector<8x64xf32>
    %cst_51 = arith.constant 1.000000e+00 : f32
    %345 = vector.broadcast %cst_51 : f32 to vector<8x64xf32>
    %346 = arith.addf %345, %344 : vector<8x64xf32>
    %347 = arith.divf %345, %346 : vector<8x64xf32>
    %348 = vector.extract_strided_slice %347 {offsets = [0, 0], sizes = [8, 32], strides = [1, 1]} : vector<8x64xf32> to vector<8x32xf32>
    %349 = vector.extract_strided_slice %347 {offsets = [0, 32], sizes = [8, 32], strides = [1, 1]} : vector<8x64xf32> to vector<8x32xf32>
    %350 = vector.extract_strided_slice %337 {offsets = [0, 64], sizes = [8, 32], strides = [1, 1]} : vector<8x96xf32> to vector<8x32xf32>
    %351 = vector.extract_strided_slice %339 {offsets = [0, 64], sizes = [8, 32], strides = [1, 1]} : vector<8x96xf32> to vector<8x32xf32>
    %352 = vector.broadcast %3 : vector<1x32xf32> to vector<8x32xf32>
    %353 = arith.addf %351, %352 : vector<8x32xf32>
    %354 = arith.mulf %348, %353 : vector<8x32xf32>
    %355 = arith.addf %350, %354 : vector<8x32xf32>
    %356 = math.tanh %355 : vector<8x32xf32>
    %cst_52 = arith.constant 1.000000e+00 : f32
    %357 = vector.broadcast %cst_52 : f32 to vector<8x32xf32>
    %358 = arith.subf %357, %349 : vector<8x32xf32>
    %359 = arith.mulf %358, %356 : vector<8x32xf32>
    %360 = arith.mulf %349, %333 : vector<8x32xf32>
    %361 = arith.addf %359, %360 : vector<8x32xf32>
    %c11_i32 = arith.constant 11 : i32
    %362 = vector.broadcast %c11_i32 : i32 to vector<8x32xi32>
    %363 = arith.cmpi eq, %26, %362 : vector<8x32xi32>
    %364 = arith.select %363, %361, %336 : vector<8x32xi1>, vector<8x32xf32>
    %365 = vector.extract_strided_slice %17 {offsets = [96, 0], sizes = [8, 96], strides = [1, 1]} : vector<120x96xf32> to vector<8x96xf32>
    %366 = arith.truncf %361 : vector<8x32xf32> to vector<8x32xbf16>
    %cst_53 = arith.constant dense<0.000000e+00> : vector<8x96xf32>
    %367 = tpu.matmul %366, %1, %cst_53 {dimension_numbers = #tpu.dot_dimension_numbers<[1], [0], [0], [1], [0, 0, 1, 1], [], []>} : vector<8x32xbf16>, vector<32x96xbf16>, vector<8x96xf32> -> vector<8x96xf32>
    %368 = vector.extract_strided_slice %365 {offsets = [0, 0], sizes = [8, 64], strides = [1, 1]} : vector<8x96xf32> to vector<8x64xf32>
    %369 = vector.extract_strided_slice %367 {offsets = [0, 0], sizes = [8, 64], strides = [1, 1]} : vector<8x96xf32> to vector<8x64xf32>
    %370 = arith.addf %368, %369 : vector<8x64xf32>
    %371 = arith.negf %370 : vector<8x64xf32>
    %372 = math.exp %371 : vector<8x64xf32>
    %cst_54 = arith.constant 1.000000e+00 : f32
    %373 = vector.broadcast %cst_54 : f32 to vector<8x64xf32>
    %374 = arith.addf %373, %372 : vector<8x64xf32>
    %375 = arith.divf %373, %374 : vector<8x64xf32>
    %376 = vector.extract_strided_slice %375 {offsets = [0, 0], sizes = [8, 32], strides = [1, 1]} : vector<8x64xf32> to vector<8x32xf32>
    %377 = vector.extract_strided_slice %375 {offsets = [0, 32], sizes = [8, 32], strides = [1, 1]} : vector<8x64xf32> to vector<8x32xf32>
    %378 = vector.extract_strided_slice %365 {offsets = [0, 64], sizes = [8, 32], strides = [1, 1]} : vector<8x96xf32> to vector<8x32xf32>
    %379 = vector.extract_strided_slice %367 {offsets = [0, 64], sizes = [8, 32], strides = [1, 1]} : vector<8x96xf32> to vector<8x32xf32>
    %380 = vector.broadcast %3 : vector<1x32xf32> to vector<8x32xf32>
    %381 = arith.addf %379, %380 : vector<8x32xf32>
    %382 = arith.mulf %376, %381 : vector<8x32xf32>
    %383 = arith.addf %378, %382 : vector<8x32xf32>
    %384 = math.tanh %383 : vector<8x32xf32>
    %cst_55 = arith.constant 1.000000e+00 : f32
    %385 = vector.broadcast %cst_55 : f32 to vector<8x32xf32>
    %386 = arith.subf %385, %377 : vector<8x32xf32>
    %387 = arith.mulf %386, %384 : vector<8x32xf32>
    %388 = arith.mulf %377, %361 : vector<8x32xf32>
    %389 = arith.addf %387, %388 : vector<8x32xf32>
    %c12_i32 = arith.constant 12 : i32
    %390 = vector.broadcast %c12_i32 : i32 to vector<8x32xi32>
    %391 = arith.cmpi eq, %26, %390 : vector<8x32xi32>
    %392 = arith.select %391, %389, %364 : vector<8x32xi1>, vector<8x32xf32>
    %393 = vector.extract_strided_slice %17 {offsets = [104, 0], sizes = [8, 96], strides = [1, 1]} : vector<120x96xf32> to vector<8x96xf32>
    %394 = arith.truncf %389 : vector<8x32xf32> to vector<8x32xbf16>
    %cst_56 = arith.constant dense<0.000000e+00> : vector<8x96xf32>
    %395 = tpu.matmul %394, %1, %cst_56 {dimension_numbers = #tpu.dot_dimension_numbers<[1], [0], [0], [1], [0, 0, 1, 1], [], []>} : vector<8x32xbf16>, vector<32x96xbf16>, vector<8x96xf32> -> vector<8x96xf32>
    %396 = vector.extract_strided_slice %393 {offsets = [0, 0], sizes = [8, 64], strides = [1, 1]} : vector<8x96xf32> to vector<8x64xf32>
    %397 = vector.extract_strided_slice %395 {offsets = [0, 0], sizes = [8, 64], strides = [1, 1]} : vector<8x96xf32> to vector<8x64xf32>
    %398 = arith.addf %396, %397 : vector<8x64xf32>
    %399 = arith.negf %398 : vector<8x64xf32>
    %400 = math.exp %399 : vector<8x64xf32>
    %cst_57 = arith.constant 1.000000e+00 : f32
    %401 = vector.broadcast %cst_57 : f32 to vector<8x64xf32>
    %402 = arith.addf %401, %400 : vector<8x64xf32>
    %403 = arith.divf %401, %402 : vector<8x64xf32>
    %404 = vector.extract_strided_slice %403 {offsets = [0, 0], sizes = [8, 32], strides = [1, 1]} : vector<8x64xf32> to vector<8x32xf32>
    %405 = vector.extract_strided_slice %403 {offsets = [0, 32], sizes = [8, 32], strides = [1, 1]} : vector<8x64xf32> to vector<8x32xf32>
    %406 = vector.extract_strided_slice %393 {offsets = [0, 64], sizes = [8, 32], strides = [1, 1]} : vector<8x96xf32> to vector<8x32xf32>
    %407 = vector.extract_strided_slice %395 {offsets = [0, 64], sizes = [8, 32], strides = [1, 1]} : vector<8x96xf32> to vector<8x32xf32>
    %408 = vector.broadcast %3 : vector<1x32xf32> to vector<8x32xf32>
    %409 = arith.addf %407, %408 : vector<8x32xf32>
    %410 = arith.mulf %404, %409 : vector<8x32xf32>
    %411 = arith.addf %406, %410 : vector<8x32xf32>
    %412 = math.tanh %411 : vector<8x32xf32>
    %cst_58 = arith.constant 1.000000e+00 : f32
    %413 = vector.broadcast %cst_58 : f32 to vector<8x32xf32>
    %414 = arith.subf %413, %405 : vector<8x32xf32>
    %415 = arith.mulf %414, %412 : vector<8x32xf32>
    %416 = arith.mulf %405, %389 : vector<8x32xf32>
    %417 = arith.addf %415, %416 : vector<8x32xf32>
    %c13_i32 = arith.constant 13 : i32
    %418 = vector.broadcast %c13_i32 : i32 to vector<8x32xi32>
    %419 = arith.cmpi eq, %26, %418 : vector<8x32xi32>
    %420 = arith.select %419, %417, %392 : vector<8x32xi1>, vector<8x32xf32>
    %421 = vector.extract_strided_slice %17 {offsets = [112, 0], sizes = [8, 96], strides = [1, 1]} : vector<120x96xf32> to vector<8x96xf32>
    %422 = arith.truncf %417 : vector<8x32xf32> to vector<8x32xbf16>
    %cst_59 = arith.constant dense<0.000000e+00> : vector<8x96xf32>
    %423 = tpu.matmul %422, %1, %cst_59 {dimension_numbers = #tpu.dot_dimension_numbers<[1], [0], [0], [1], [0, 0, 1, 1], [], []>} : vector<8x32xbf16>, vector<32x96xbf16>, vector<8x96xf32> -> vector<8x96xf32>
    %424 = vector.extract_strided_slice %421 {offsets = [0, 0], sizes = [8, 64], strides = [1, 1]} : vector<8x96xf32> to vector<8x64xf32>
    %425 = vector.extract_strided_slice %423 {offsets = [0, 0], sizes = [8, 64], strides = [1, 1]} : vector<8x96xf32> to vector<8x64xf32>
    %426 = arith.addf %424, %425 : vector<8x64xf32>
    %427 = arith.negf %426 : vector<8x64xf32>
    %428 = math.exp %427 : vector<8x64xf32>
    %cst_60 = arith.constant 1.000000e+00 : f32
    %429 = vector.broadcast %cst_60 : f32 to vector<8x64xf32>
    %430 = arith.addf %429, %428 : vector<8x64xf32>
    %431 = arith.divf %429, %430 : vector<8x64xf32>
    %432 = vector.extract_strided_slice %431 {offsets = [0, 0], sizes = [8, 32], strides = [1, 1]} : vector<8x64xf32> to vector<8x32xf32>
    %433 = vector.extract_strided_slice %431 {offsets = [0, 32], sizes = [8, 32], strides = [1, 1]} : vector<8x64xf32> to vector<8x32xf32>
    %434 = vector.extract_strided_slice %421 {offsets = [0, 64], sizes = [8, 32], strides = [1, 1]} : vector<8x96xf32> to vector<8x32xf32>
    %435 = vector.extract_strided_slice %423 {offsets = [0, 64], sizes = [8, 32], strides = [1, 1]} : vector<8x96xf32> to vector<8x32xf32>
    %436 = vector.broadcast %3 : vector<1x32xf32> to vector<8x32xf32>
    %437 = arith.addf %435, %436 : vector<8x32xf32>
    %438 = arith.mulf %432, %437 : vector<8x32xf32>
    %439 = arith.addf %434, %438 : vector<8x32xf32>
    %440 = math.tanh %439 : vector<8x32xf32>
    %cst_61 = arith.constant 1.000000e+00 : f32
    %441 = vector.broadcast %cst_61 : f32 to vector<8x32xf32>
    %442 = arith.subf %441, %433 : vector<8x32xf32>
    %443 = arith.mulf %442, %440 : vector<8x32xf32>
    %444 = arith.mulf %433, %417 : vector<8x32xf32>
    %445 = arith.addf %443, %444 : vector<8x32xf32>
    %c14_i32 = arith.constant 14 : i32
    %446 = vector.broadcast %c14_i32 : i32 to vector<8x32xi32>
    %447 = arith.cmpi eq, %26, %446 : vector<8x32xi32>
    %448 = arith.select %447, %445, %420 : vector<8x32xi1>, vector<8x32xf32>
    %c0_62 = arith.constant 0 : index
    %c0_63 = arith.constant 0 : index
    %449 = vector.load %arg6[%c0_62, %c0_63] : memref<8x32xf32, #tpu.memory_space<vmem>>, vector<8x32xf32>
    tpu.vector_store %arg6[%c0_62, %c0_63], %448 {strides = array<i32>} : memref<8x32xf32, #tpu.memory_space<vmem>>, vector<8x32xf32>,
    return
  }
}

</mosaic_0001>

<bundles_post_ra>
// kernel: gru_transform_forward.1
= control target key start
LH: loop header
LB: loop body
LE: loop exit
PB: predicated region body
PF: predicated region fallthrough
CT: control target
= control target key end

     0   :  { %v1222_v3 = vmov 0   ;;  %vm66_vm0 = vcmask 130048   ;;  %s1223_s17 = smov 64   ;;  %v31_v22 = vlaneseq  ;;  %vm146_vm6 = vcmask 261120   ;;  %s1587_s1 = inlined_call_operand.vmem [shape: f32[16,96], index: 1, kind: input, shape index: {}]   ;;  %s1588_s0 = inlined_call_operand.vmem [shape: f32[120,16], index: 0, kind: input, shape index: {}]   ;;  %s1589_s2 = inlined_call_operand.vmem [shape: f32[32,96], index: 2, kind: input, shape index: {}]   ;;  %s1590_s4 = inlined_call_operand.vmem [shape: f32[1,96], index: 4, kind: input, shape index: {}]   ;;  %s1591_s3 = inlined_call_operand.vmem [shape: f32[1,96], index: 3, kind: input, shape index: {}]   ;;  %s1592_s5 = inlined_call_operand.vmem [shape: s32[8,1], index: 5, kind: input, shape index: {}]   ;;  %s1593_s6 = inlined_call_operand.vmem [shape: f32[8,32], index: 6, kind: output, shape index: {}]  }
   0x1   :  { %v60_v0 = vld [vmem:[%s1587_s1] sm:$0xff]  ;;  %v61_v1 = vld [vmem:[%s1587_s1 + $0x8] sm:$0xff]  ;;  %1128 = vset.pattern.permute.xlu1 %v1222_v3  ;;  %1129 = vset.pattern.permute.xlu0 %v1222_v3  ;;  %v26_v6 = vld [vmem:[%s1589_s2 + $0x10] sm:$0xff] }
   0x2   :  { %v49_v2 = vld [vmem:[%s1588_s0 + $0x60] sm:$0xff]  ;;  %v62_v4 = vpack.c.bf16 %v61_v1, %v60_v0  ;;  %v50_v5 = vld [vmem:[%s1588_s0 + $0x68] sm:$0xff]  ;;  %v27_v7 = vld [vmem:[%s1589_s2 + $0x18] sm:$0xff]  ;;  %v32_v23 = vand.u32 127, %v31_v22 }
   0x3   :  { %v58_v8 = vpack.c.bf16 %v50_v5, %v49_v2  ;;  %v1278_v9 = vpack.c.bf16 %v27_v7, %v26_v6  ;;  %v24_v10 = vld [vmem:[%s1589_s2] sm:$0xff]  ;;  %v25_v11 = vld [vmem:[%s1589_s2 + $0x8] sm:$0xff]  ;;  %v51_v50 = vld [vmem:[%s1588_s0 + $0x70] sm:$0xff] }
   0x4   :  { %v37_v12 = vld [vmem:[%s1588_s0] sm:$0xff]  ;;  %1123 = vmatpush.bf16.msra.mxu1 %v62_v4  ;;  %98 = vmatpush.bf16.msra.mxu0 %v62_v4  ;;  %v38_v13 = vld [vmem:[%s1588_s0 + $0x8] sm:$0xff]  ;;  %v1293_v14 = vpack.c.bf16 %v25_v11, %v24_v10  ;;  %vm34_vm1 = vcmp.lt.s32.totalorder %v32_v23, 64  ;;  %v59_v51 = vpack.c.bf16 %v51_v50, %v51_v50 }
   0x5   :  { %v52_v15 = vpack.c.bf16 %v38_v13, %v37_v12  ;;  %1124 = vmatpush.bf16.msra.mxu2 %v62_v4  ;;  %283 = vmatpush.bf16.msra.mxu3 %v1278_v9  ;;  %v1315_v18 = vld [vmem:[%s1590_s4] ss:$0 sm:$0xff] }
   0x6   :  { %v30_v24 = vld [vmem:[%s1590_s4] sm:$0x1] }
   0x7   :  { %1091 = vmatmul.msk.bf16.vlgmr.msra.gmra.mxu1 %vm66_vm0, %v58_v8  ;;  %1085 = vmatmul.msk.bf16.vlgmr.msra.gmra.mxu0 %vm66_vm0, %v52_v15  ;;  %v33_v25 = vld [vmem:[%s1591_s3] sm:$0x1]  ;;  %v35_v26 = vsel %vm34_vm1, %v30_v24, 0.0  ;;  %s1224_s3 = smov 96  }
   0x8   :  { %156 = vmatpush.bf16.msrb.mxu1 %v1278_v9  ;;  %v36_v27 = vadd.f32 %v35_v26, %v33_v25  ;;  %1092 = vmatmul.msk.bf16.vlgmr.msra.gmra.mxu2 %vm66_vm0, %v59_v51 }
   0x9   :  { %221 = vmatpush.bf16.msrb.mxu2 %v1278_v9  ;;  %284 = vmatpush.bf16.msra.mxu3 %v1293_v14 }
   0xa   :  { %v1325_v29 = vperm.slane %v36_v27, 0 }
   0xc   :  { %157 = vmatpush.bf16.msrb.mxu1 %v1293_v14 }
   0xd   :  { %222 = vmatpush.bf16.msrb.mxu2 %v1293_v14  ;;  %469 = vmatpush.bf16.msrb.mxu3 %v1278_v9 }
  0x10   :  { %345 = vmatpush.bf16.msra.mxu1 %v1278_v9 }
  0x11   :  { %470 = vmatpush.bf16.msrb.mxu3 %v1293_v14  ;;  %407 = vmatpush.bf16.msra.mxu2 %v1278_v9 }
  0x14   :  { %346 = vmatpush.bf16.msra.mxu1 %v1293_v14 }
  0x15   :  { %408 = vmatpush.bf16.msra.mxu2 %v1293_v14 }
  0x17   :  { %158 = vmatmul.bf16.vlgmr.msrb.gmra.mxu1 %v1222_v3 }
  0x18   :  { %531 = vmatpush.bf16.msrb.mxu1 %v1278_v9 }
  0x1c   :  { %532 = vmatpush.bf16.msrb.mxu1 %v1293_v14 }
  0x84   :  { %v1308_v16 = vpop.f32.mrf.mxu1  ;;  %v100_v28 = vpop.f32.mrf.mxu0 }
  0x85   :  { %v101_v30 = vadd.f32 %v100_v28, %v1325_v29 }
  0x8b   :  { %v1341_v58 = vpop.f32.mrf.mxu2 }
  0x8c   :  { %v1310_v17 = vpop.f32.mrf.mxu1  ;;  %v102_v0 = vpop.f32.mrf.mxu0 }
  0x8d   :  { %v103_v1 = vadd.f32 %v102_v0, %v1325_v29 }
  0x93   :  { %v137_v59 = vpop.f32.mrf.mxu2 }
  0x94   :  { %v159_v19 = vpop.f32.mrf.mxu1 }
  0x95   :  { %v186_v20 = vadd.f32 %v1315_v18, %v159_v19  ;;  %v163_v31 = vadd.f32 %v159_v19, %v101_v30 }
  0x97   :  { %188 = vrot.lane.b32.xlu0 %v186_v20, %s1223_s17  ;;  %v1094_v32 = vmul.f32 -1.442695, %v163_v31 }
  0x99   :  { %1131 = vpow2.f32 %v1094_v32 }
  0x9c   :  { %v161_v21 = vpop.f32.mrf.mxu1 }
  0x9f   :  { %v1132_v33 = vpop.eup %1131 }
  0xa0   :  { %v167_v34 = vadd.f32 1.0, %v1132_v33  ;;  %v39_v33 = vld [vmem:[%s1588_s0 + $0x10] sm:$0xff] }
  0xa2   :  { %1133 = vrcp.f32 %v167_v34  ;;  %v179_v40 = vand.u32 2147483648, %v167_v34  ;;  %vm173_vm3 = vweird.f32 %v167_v34  ;;  %v177_v41 = vand.u32 2147483647, %v167_v34 }
  0xa4   :  { %v180_v43 = vor.u32 1.1754944e-38, %v179_v40  ;;  %vm178_vm5 = vcmp.eq.f32.partialorder %v177_v41, 8.507059e+37 }
  0xa8   :  { %v1134_v35 = vpop.eup %1133 }
  0xa9   :  { %v169_v36 = vmul.f32 %v1134_v35, %v167_v34  ;;  %vm174_vm2 = vweird.f32 %v1134_v35  ;;  %v40_v34 = vld [vmem:[%s1588_s0 + $0x18] sm:$0xff] }
  0xaa   :  { %vm175_vm4 = vmor %vm173_vm3, %vm174_vm2 }
  0xab   :  { %v170_v37 = vsub.f32 1.0, %v169_v36 }
  0xad   :  { %v171_v38 = vmul.f32 %v1134_v35, %v170_v37 }
  0xaf   :  { %v172_v39 = vadd.f32 %v1134_v35, %v171_v38 }
  0xb1   :  { %v176_v42 = vsel %vm175_vm4, %v1134_v35, %v172_v39  ;;  %v53_v35 = vpack.c.bf16 %v40_v34, %v39_v33 }
  0xb2   :  { %v181_v45 = vsel %vm178_vm5, %v180_v43, %v176_v42 }
  0xb3   :  { %v198_v52 = vsub.f32 1.0, %v181_v45  ;;  %v204_v54 = vmul.f32 0.0, %v181_v45  ;;  %1086 = vmatmul.msk.bf16.gmra.mxu0 %vm66_vm0, %v53_v35 }
 0x109   :  { %v189_v44 = vpop.permute.xlu0 %188 }
 0x10a   :  { %v191_v46 = vmul.f32 %v189_v44, %v181_v45 }
 0x10c   :  { %193 = vrot.lane.b32.xlu0 %v191_v46, %s1223_s17 }
 0x130   :  { %v105_v40 = vpop.f32.mrf.mxu0 }
 0x131   :  { %v106_v41 = vadd.f32 %v105_v40, %v1325_v29 }
 0x17e   :  { %v194_v47 = vpop.permute.xlu0 %193 }
 0x17f   :  { %v196_v48 = vadd.f32 %v194_v47, %v101_v30 }
 0x181   :  { %1135 = vtanh.f32 %v196_v48 }
 0x187   :  { %v1136_v49 = vpop.eup %1135 }
 0x188   :  { %200 = vrot.lane.b32.xlu1 %v1136_v49, %s1224_s3 }
 0x1fa   :  { %v201_v53 = vpop.permute.xlu1 %200 }
 0x1fb   :  { %v203_v55 = vmul.f32 %v201_v53, %v198_v52 }
 0x1fd   :  { %v1336_v56 = vadd.f32 %v204_v54, %v203_v55 }
 0x1ff   :  { %v208_v57 = vpack.c.bf16 %v1336_v56, %v1336_v56 }
 0x201   :  { %210 = vrot.lane.b32.xlu1 %v208_v57, %s1224_s3 }
 0x273   :  { %v211_v60 = vpop.permute.xlu1 %210 }
 0x274   :  { %1095 = vmatmul.msk.bf16.vlgmr.msrb.gmra.mxu2 %vm146_vm6, %v211_v60 }
 0x275   :  { %593 = vmatpush.bf16.msrb.mxu2 %v1278_v9 }
 0x279   :  { %594 = vmatpush.bf16.msrb.mxu2 %v1293_v14 }
 0x2f7   :  { %v224_v61 = vpop.f32.mrf.mxu2 }
 0x2f8   :  { %v248_v62 = vadd.f32 %v1315_v18, %v224_v61  ;;  %v228_v2 = vadd.f32 %v224_v61, %v103_v1 }
 0x2fa   :  { %250 = vrot.lane.b32.xlu2 %v248_v62, %s1223_s17  ;;  %v1096_v3 = vmul.f32 -1.442695, %v228_v2 }
 0x2fc   :  { %1137 = vpow2.f32 %v1096_v3 }
 0x2ff   :  { %v226_v63 = vpop.f32.mrf.mxu2 }
 0x302   :  { %v1138_v4 = vpop.eup %1137 }
 0x303   :  { %v232_v5 = vadd.f32 1.0, %v1138_v4 }
 0x305   :  { %1139 = vrcp.f32 %v232_v5  ;;  %v244_v12 = vand.u32 2147483648, %v232_v5  ;;  %vm238_vm8 = vweird.f32 %v232_v5  ;;  %v242_v13 = vand.u32 2147483647, %v232_v5 }
 0x307   :  { %v245_v19 = vor.u32 1.1754944e-38, %v244_v12  ;;  %vm243_vm10 = vcmp.eq.f32.partialorder %v242_v13, 8.507059e+37 }
 0x30b   :  { %v1140_v6 = vpop.eup %1139 }
 0x30c   :  { %v234_v7 = vmul.f32 %v1140_v6, %v232_v5  ;;  %vm239_vm7 = vweird.f32 %v1140_v6 }
 0x30d   :  { %vm240_vm9 = vmor %vm238_vm8, %vm239_vm7 }
 0x30e   :  { %v235_v8 = vsub.f32 1.0, %v234_v7 }
 0x310   :  { %v236_v10 = vmul.f32 %v1140_v6, %v235_v8 }
 0x312   :  { %v237_v11 = vadd.f32 %v1140_v6, %v236_v10  ;;  %v107_v10 = vpop.f32.mrf.mxu0 }
 0x314   :  { %v241_v15 = vsel %vm240_vm9, %v1140_v6, %v237_v11  ;;  %v108_v11 = vadd.f32 %v107_v10, %v1325_v29 }
 0x315   :  { %v246_v21 = vsel %vm243_vm10, %v245_v19, %v241_v15 }
 0x316   :  { %v260_v26 = vsub.f32 1.0, %v246_v21  ;;  %v266_v28 = vmul.f32 %v246_v21, %v1336_v56 }
 0x354   :  { %v251_v20 = vpop.permute.xlu2 %250 }
 0x355   :  { %v253_v22 = vmul.f32 %v251_v20, %v246_v21 }
 0x357   :  { %255 = vrot.lane.b32.xlu2 %v253_v22, %s1223_s17 }
 0x3b1   :  { %v256_v23 = vpop.permute.xlu2 %255 }
 0x3b2   :  { %v258_v24 = vadd.f32 %v256_v23, %v103_v1 }
 0x3b4   :  { %1141 = vtanh.f32 %v258_v24 }
 0x3ba   :  { %v1142_v25 = vpop.eup %1141 }
 0x3bb   :  { %262 = vrot.lane.b32.xlu0 %v1142_v25, %s1224_s3 }
 0x42d   :  { %v263_v27 = vpop.permute.xlu0 %262 }
 0x42e   :  { %v265_v30 = vmul.f32 %v263_v27, %v260_v26 }
 0x430   :  { %v1352_v31 = vadd.f32 %v266_v28, %v265_v30 }
 0x432   :  { %v270_v32 = vpack.c.bf16 %v1352_v31, %v1352_v31 }
 0x434   :  { %272 = vrot.lane.b32.xlu1 %v270_v32, %s1224_s3 }
 0x4a6   :  { %v273_v36 = vpop.permute.xlu1 %272 }
 0x4a7   :  { %1097 = vmatmul.msk.bf16.vlgmr.msra.gmra.mxu3 %vm146_vm6, %v273_v36 }
 0x4a8   :  { %655 = vmatpush.bf16.msra.mxu3 %v1278_v9 }
 0x4ac   :  { %656 = vmatpush.bf16.msra.mxu3 %v1293_v14 }
 0x52a   :  { %v286_v37 = vpop.f32.mrf.mxu3 }
 0x52b   :  { %v310_v38 = vadd.f32 %v1315_v18, %v286_v37  ;;  %v290_v42 = vadd.f32 %v286_v37, %v106_v41 }
 0x52d   :  { %312 = vrot.lane.b32.xlu2 %v310_v38, %s1223_s17  ;;  %v1098_v43 = vmul.f32 -1.442695, %v290_v42 }
 0x52f   :  { %1143 = vpow2.f32 %v1098_v43  ;;  %v41_v43 = vld [vmem:[%s1588_s0 + $0x20] sm:$0xff] }
 0x532   :  { %v288_v39 = vpop.f32.mrf.mxu3 }
 0x535   :  { %v1144_v44 = vpop.eup %1143 }
 0x536   :  { %v294_v45 = vadd.f32 1.0, %v1144_v44  ;;  %v42_v44 = vld [vmem:[%s1588_s0 + $0x28] sm:$0xff] }
 0x538   :  { %1145 = vrcp.f32 %v294_v45  ;;  %v306_v51 = vand.u32 2147483648, %v294_v45  ;;  %vm300_vm12 = vweird.f32 %v294_v45  ;;  %v304_v52 = vand.u32 2147483647, %v294_v45 }
 0x53a   :  { %v307_v54 = vor.u32 1.1754944e-38, %v306_v51  ;;  %vm305_vm14 = vcmp.eq.f32.partialorder %v304_v52, 8.507059e+37 }
 0x53e   :  { %v1146_v46 = vpop.eup %1145 }
 0x53f   :  { %v296_v47 = vmul.f32 %v1146_v46, %v294_v45  ;;  %vm301_vm11 = vweird.f32 %v1146_v46  ;;  %v54_v45 = vpack.c.bf16 %v42_v44, %v41_v43 }
 0x540   :  { %vm302_vm13 = vmor %vm300_vm12, %vm301_vm11 }
 0x541   :  { %v297_v48 = vsub.f32 1.0, %v296_v47  ;;  %1087 = vmatmul.msk.bf16.gmra.mxu0 %vm66_vm0, %v54_v45 }
 0x543   :  { %v298_v49 = vmul.f32 %v1146_v46, %v297_v48 }
 0x545   :  { %v299_v50 = vadd.f32 %v1146_v46, %v298_v49 }
 0x547   :  { %v303_v53 = vsel %vm302_vm13, %v1146_v46, %v299_v50 }
 0x548   :  { %v308_v57 = vsel %vm305_vm14, %v307_v54, %v303_v53 }
 0x549   :  { %v322_v63 = vsub.f32 1.0, %v308_v57  ;;  %v328_v1 = vmul.f32 %v308_v57, %v1352_v31 }
 0x587   :  { %v313_v55 = vpop.permute.xlu2 %312 }
 0x588   :  { %v315_v59 = vmul.f32 %v313_v55, %v308_v57 }
 0x58a   :  { %317 = vrot.lane.b32.xlu0 %v315_v59, %s1223_s17 }
 0x5be   :  { %v110_v50 = vpop.f32.mrf.mxu0 }
 0x5bf   :  { %v111_v51 = vadd.f32 %v110_v50, %v1325_v29  ;;  %v44_v50 = vld [vmem:[%s1588_s0 + $0x38] sm:$0xff] }
 0x5fc   :  { %v318_v60 = vpop.permute.xlu0 %317 }
 0x5fd   :  { %v320_v61 = vadd.f32 %v318_v60, %v106_v41 }
 0x5ff   :  { %1147 = vtanh.f32 %v320_v61 }
 0x605   :  { %v1148_v62 = vpop.eup %1147 }
 0x606   :  { %324 = vrot.lane.b32.xlu1 %v1148_v62, %s1224_s3 }
 0x678   :  { %v325_v0 = vpop.permute.xlu1 %324 }
 0x679   :  { %v327_v2 = vmul.f32 %v325_v0, %v322_v63 }
 0x67b   :  { %v1373_v3 = vadd.f32 %v328_v1, %v327_v2 }
 0x67d   :  { %v332_v4 = vpack.c.bf16 %v1373_v3, %v1373_v3 }
 0x67f   :  { %334 = vrot.lane.b32.xlu2 %v332_v4, %s1224_s3 }
 0x6d9   :  { %v335_v5 = vpop.permute.xlu2 %334 }
 0x6da   :  { %1099 = vmatmul.msk.bf16.vlgmr.msra.gmra.mxu1 %vm146_vm6, %v335_v5 }
 0x6db   :  { %717 = vmatpush.bf16.msra.mxu1 %v1278_v9 }
 0x6df   :  { %718 = vmatpush.bf16.msra.mxu1 %v1293_v14 }
 0x757   :  { %v348_v6 = vpop.f32.mrf.mxu1 }
 0x758   :  { %v372_v7 = vadd.f32 %v1315_v18, %v348_v6  ;;  %v352_v12 = vadd.f32 %v348_v6, %v108_v11 }
 0x75a   :  { %374 = vrot.lane.b32.xlu0 %v372_v7, %s1223_s17  ;;  %v1100_v13 = vmul.f32 -1.442695, %v352_v12 }
 0x75c   :  { %1149 = vpow2.f32 %v1100_v13 }
 0x75f   :  { %v350_v8 = vpop.f32.mrf.mxu1 }
 0x762   :  { %v1150_v15 = vpop.eup %1149 }
 0x763   :  { %v356_v19 = vadd.f32 1.0, %v1150_v15 }
 0x765   :  { %1151 = vrcp.f32 %v356_v19  ;;  %v368_v25 = vand.u32 2147483648, %v356_v19  ;;  %vm362_vm1 = vweird.f32 %v356_v19  ;;  %v366_v26 = vand.u32 2147483647, %v356_v19 }
 0x767   :  { %v369_v28 = vor.u32 1.1754944e-38, %v368_v25  ;;  %vm367_vm3 = vcmp.eq.f32.partialorder %v366_v26, 8.507059e+37  ;;  %v112_v25 = vpop.f32.mrf.mxu0 }
 0x768   :  { %v113_v26 = vadd.f32 %v112_v25, %v1325_v29 }
 0x76b   :  { %v1152_v20 = vpop.eup %1151 }
 0x76c   :  { %v358_v21 = vmul.f32 %v1152_v20, %v356_v19  ;;  %vm363_vm15 = vweird.f32 %v1152_v20 }
 0x76d   :  { %vm364_vm2 = vmor %vm362_vm1, %vm363_vm15 }
 0x76e   :  { %v359_v22 = vsub.f32 1.0, %v358_v21 }
 0x770   :  { %v360_v23 = vmul.f32 %v1152_v20, %v359_v22 }
 0x772   :  { %v361_v24 = vadd.f32 %v1152_v20, %v360_v23 }
 0x774   :  { %v365_v27 = vsel %vm364_vm2, %v1152_v20, %v361_v24 }
 0x775   :  { %v370_v32 = vsel %vm367_vm3, %v369_v28, %v365_v27 }
 0x776   :  { %v384_v37 = vsub.f32 1.0, %v370_v32  ;;  %v390_v39 = vmul.f32 %v370_v32, %v1373_v3 }
 0x7cc   :  { %v375_v30 = vpop.permute.xlu0 %374 }
 0x7cd   :  { %v377_v33 = vmul.f32 %v375_v30, %v370_v32 }
 0x7cf   :  { %379 = vrot.lane.b32.xlu1 %v377_v33, %s1223_s17 }
 0x841   :  { %v380_v34 = vpop.permute.xlu1 %379 }
 0x842   :  { %v382_v35 = vadd.f32 %v380_v34, %v108_v11 }
 0x844   :  { %1153 = vtanh.f32 %v382_v35 }
 0x84a   :  { %v1154_v36 = vpop.eup %1153 }
 0x84b   :  { %386 = vrot.lane.b32.xlu2 %v1154_v36, %s1224_s3 }
 0x8a5   :  { %v387_v38 = vpop.permute.xlu2 %386 }
 0x8a6   :  { %v389_v40 = vmul.f32 %v387_v38, %v384_v37 }
 0x8a8   :  { %v1387_v41 = vadd.f32 %v390_v39, %v389_v40 }
 0x8aa   :  { %v394_v42 = vpack.c.bf16 %v1387_v41, %v1387_v41 }
 0x8ac   :  { %396 = vrot.lane.b32.xlu0 %v394_v42, %s1224_s3 }
 0x91e   :  { %v397_v46 = vpop.permute.xlu0 %396 }
 0x91f   :  { %1101 = vmatmul.msk.bf16.vlgmr.msra.gmra.mxu2 %vm146_vm6, %v397_v46 }
 0x920   :  { %779 = vmatpush.bf16.msra.mxu2 %v1278_v9 }
 0x924   :  { %780 = vmatpush.bf16.msra.mxu2 %v1293_v14 }
 0x9a2   :  { %v410_v47 = vpop.f32.mrf.mxu2 }
 0x9a3   :  { %v434_v48 = vadd.f32 %v1315_v18, %v410_v47  ;;  %v414_v52 = vadd.f32 %v410_v47, %v111_v51 }
 0x9a5   :  { %436 = vrot.lane.b32.xlu1 %v434_v48, %s1223_s17  ;;  %v1102_v53 = vmul.f32 -1.442695, %v414_v52 }
 0x9a7   :  { %1155 = vpow2.f32 %v1102_v53 }
 0x9aa   :  { %v412_v49 = vpop.f32.mrf.mxu2 }
 0x9ab   :  { %v43_v49 = vld [vmem:[%s1588_s0 + $0x30] sm:$0xff] }
 0x9ad   :  { %v1156_v54 = vpop.eup %1155 }
 0x9ae   :  { %v418_v55 = vadd.f32 1.0, %v1156_v54 }
 0x9b0   :  { %1157 = vrcp.f32 %v418_v55  ;;  %v430_v63 = vand.u32 2147483648, %v418_v55  ;;  %vm424_vm5 = vweird.f32 %v418_v55  ;;  %v428_v0 = vand.u32 2147483647, %v418_v55 }
 0x9b2   :  { %v431_v2 = vor.u32 1.1754944e-38, %v430_v63  ;;  %vm429_vm8 = vcmp.eq.f32.partialorder %v428_v0, 8.507059e+37 }
 0x9b6   :  { %v1158_v57 = vpop.eup %1157 }
 0x9b7   :  { %v420_v59 = vmul.f32 %v1158_v57, %v418_v55  ;;  %vm425_vm4 = vweird.f32 %v1158_v57 }
 0x9b8   :  { %vm426_vm7 = vmor %vm424_vm5, %vm425_vm4 }
 0x9b9   :  { %v421_v60 = vsub.f32 1.0, %v420_v59 }
 0x9bb   :  { %v422_v61 = vmul.f32 %v1158_v57, %v421_v60 }
 0x9bd   :  { %v423_v62 = vadd.f32 %v1158_v57, %v422_v61 }
 0x9bf   :  { %v427_v1 = vsel %vm426_vm7, %v1158_v57, %v423_v62 }
 0x9c0   :  { %v432_v5 = vsel %vm429_vm8, %v431_v2, %v427_v1 }
 0x9c1   :  { %v446_v11 = vsub.f32 1.0, %v432_v5  ;;  %v452_v13 = vmul.f32 %v432_v5, %v1387_v41 }
 0xa17   :  { %v437_v4 = vpop.permute.xlu1 %436 }
 0xa18   :  { %v439_v6 = vmul.f32 %v437_v4, %v432_v5 }
 0xa1a   :  { %441 = vrot.lane.b32.xlu2 %v439_v6, %s1223_s17 }
 0xa74   :  { %v442_v7 = vpop.permute.xlu2 %441 }
 0xa75   :  { %v444_v8 = vadd.f32 %v442_v7, %v111_v51  ;;  %v55_v51 = vpack.c.bf16 %v44_v50, %v43_v49 }
 0xa77   :  { %1159 = vtanh.f32 %v444_v8  ;;  %1088 = vmatmul.msk.bf16.gmra.mxu0 %vm66_vm0, %v55_v51 }
 0xa7d   :  { %v1160_v10 = vpop.eup %1159 }
 0xa7e   :  { %448 = vrot.lane.b32.xlu0 %v1160_v10, %s1224_s3 }
 0xaf0   :  { %v449_v12 = vpop.permute.xlu0 %448 }
 0xaf1   :  { %v451_v15 = vmul.f32 %v449_v12, %v446_v11 }
 0xaf3   :  { %v1408_v19 = vadd.f32 %v452_v13, %v451_v15 }
 0xaf4   :  { %v115_v0 = vpop.f32.mrf.mxu0 }
 0xaf5   :  { %v456_v20 = vpack.c.bf16 %v1408_v19, %v1408_v19  ;;  %v116_v1 = vadd.f32 %v115_v0, %v1325_v29 }
 0xaf7   :  { %458 = vrot.lane.b32.xlu1 %v456_v20, %s1224_s3 }
 0xb69   :  { %v459_v21 = vpop.permute.xlu1 %458 }
 0xb6a   :  { %1103 = vmatmul.msk.bf16.vlgmr.msrb.gmra.mxu3 %vm146_vm6, %v459_v21 }
 0xb6b   :  { %841 = vmatpush.bf16.msrb.mxu3 %v1278_v9 }
 0xb6f   :  { %842 = vmatpush.bf16.msrb.mxu3 %v1293_v14 }
 0xbed   :  { %v472_v22 = vpop.f32.mrf.mxu3 }
 0xbee   :  { %v496_v23 = vadd.f32 %v1315_v18, %v472_v22  ;;  %v476_v27 = vadd.f32 %v472_v22, %v113_v26 }
 0xbf0   :  { %498 = vrot.lane.b32.xlu2 %v496_v23, %s1223_s17  ;;  %v1104_v28 = vmul.f32 -1.442695, %v476_v27 }
 0xbf2   :  { %1161 = vpow2.f32 %v1104_v28 }
 0xbf5   :  { %v474_v24 = vpop.f32.mrf.mxu3 }
 0xbf8   :  { %v1162_v30 = vpop.eup %1161 }
 0xbf9   :  { %v480_v32 = vadd.f32 1.0, %v1162_v30 }
 0xbfb   :  { %1163 = vrcp.f32 %v480_v32  ;;  %v492_v38 = vand.u32 2147483648, %v480_v32  ;;  %vm486_vm10 = vweird.f32 %v480_v32  ;;  %v490_v39 = vand.u32 2147483647, %v480_v32 }
 0xbfd   :  { %v493_v42 = vor.u32 1.1754944e-38, %v492_v38  ;;  %vm491_vm12 = vcmp.eq.f32.partialorder %v490_v39, 8.507059e+37 }
 0xc01   :  { %v1164_v33 = vpop.eup %1163 }
 0xc02   :  { %v482_v34 = vmul.f32 %v1164_v33, %v480_v32  ;;  %vm487_vm9 = vweird.f32 %v1164_v33 }
 0xc03   :  { %vm488_vm11 = vmor %vm486_vm10, %vm487_vm9 }
 0xc04   :  { %v483_v35 = vsub.f32 1.0, %v482_v34 }
 0xc06   :  { %v484_v36 = vmul.f32 %v1164_v33, %v483_v35 }
 0xc08   :  { %v485_v37 = vadd.f32 %v1164_v33, %v484_v36 }
 0xc0a   :  { %v489_v40 = vsel %vm488_vm11, %v1164_v33, %v485_v37 }
 0xc0b   :  { %v494_v44 = vsel %vm491_vm12, %v493_v42, %v489_v40  ;;  %v117_v40 = vpop.f32.mrf.mxu0 }
 0xc0c   :  { %v508_v52 = vsub.f32 1.0, %v494_v44  ;;  %v514_v54 = vmul.f32 %v494_v44, %v1408_v19  ;;  %v118_v42 = vadd.f32 %v117_v40, %v1325_v29 }
 0xc4a   :  { %v499_v43 = vpop.permute.xlu2 %498 }
 0xc4b   :  { %v501_v45 = vmul.f32 %v499_v43, %v494_v44 }
 0xc4d   :  { %503 = vrot.lane.b32.xlu0 %v501_v45, %s1223_s17 }
 0xcbf   :  { %v504_v46 = vpop.permute.xlu0 %503 }
 0xcc0   :  { %v506_v47 = vadd.f32 %v504_v46, %v113_v26 }
 0xcc2   :  { %1165 = vtanh.f32 %v506_v47 }
 0xcc8   :  { %v1166_v48 = vpop.eup %1165 }
 0xcc9   :  { %510 = vrot.lane.b32.xlu1 %v1166_v48, %s1224_s3 }
 0xd3b   :  { %v511_v53 = vpop.permute.xlu1 %510 }
 0xd3c   :  { %v513_v55 = vmul.f32 %v511_v53, %v508_v52 }
 0xd3e   :  { %v1429_v57 = vadd.f32 %v514_v54, %v513_v55 }
 0xd40   :  { %v518_v59 = vpack.c.bf16 %v1429_v57, %v1429_v57 }
 0xd42   :  { %520 = vrot.lane.b32.xlu2 %v518_v59, %s1224_s3 }
 0xd9c   :  { %v521_v60 = vpop.permute.xlu2 %520 }
 0xd9d   :  { %1105 = vmatmul.msk.bf16.vlgmr.msrb.gmra.mxu1 %vm146_vm6, %v521_v60 }
 0xd9e   :  { %903 = vmatpush.bf16.msrb.mxu1 %v1278_v9 }
 0xda2   :  { %904 = vmatpush.bf16.msrb.mxu1 %v1293_v14 }
 0xe1a   :  { %v534_v61 = vpop.f32.mrf.mxu1 }
 0xe1b   :  { %v558_v62 = vadd.f32 %v1315_v18, %v534_v61  ;;  %v538_v2 = vadd.f32 %v534_v61, %v116_v1 }
 0xe1d   :  { %560 = vrot.lane.b32.xlu0 %v558_v62, %s1223_s17  ;;  %v1106_v4 = vmul.f32 -1.442695, %v538_v2 }
 0xe1f   :  { %1167 = vpow2.f32 %v1106_v4 }
 0xe22   :  { %v536_v63 = vpop.f32.mrf.mxu1 }
 0xe25   :  { %v1168_v5 = vpop.eup %1167 }
 0xe26   :  { %v542_v6 = vadd.f32 1.0, %v1168_v5 }
 0xe28   :  { %1169 = vrcp.f32 %v542_v6  ;;  %v554_v13 = vand.u32 2147483648, %v542_v6  ;;  %vm548_vm14 = vweird.f32 %v542_v6  ;;  %v552_v15 = vand.u32 2147483647, %v542_v6 }
 0xe2a   :  { %v555_v21 = vor.u32 1.1754944e-38, %v554_v13  ;;  %vm553_vm1 = vcmp.eq.f32.partialorder %v552_v15, 8.507059e+37 }
 0xe2e   :  { %v1170_v7 = vpop.eup %1169 }
 0xe2f   :  { %v544_v8 = vmul.f32 %v1170_v7, %v542_v6  ;;  %vm549_vm13 = vweird.f32 %v1170_v7 }
 0xe30   :  { %vm550_vm15 = vmor %vm548_vm14, %vm549_vm13 }
 0xe31   :  { %v545_v10 = vsub.f32 1.0, %v544_v8  ;;  %v45_v8 = vld [vmem:[%s1588_s0 + $0x40] sm:$0xff] }
 0xe33   :  { %v546_v11 = vmul.f32 %v1170_v7, %v545_v10  ;;  %v46_v10 = vld [vmem:[%s1588_s0 + $0x48] sm:$0xff] }
 0xe35   :  { %v547_v12 = vadd.f32 %v1170_v7, %v546_v11  ;;  %v56_v11 = vpack.c.bf16 %v46_v10, %v45_v8 }
 0xe37   :  { %v551_v20 = vsel %vm550_vm15, %v1170_v7, %v547_v12  ;;  %1089 = vmatmul.msk.bf16.gmra.mxu0 %vm66_vm0, %v56_v11 }
 0xe38   :  { %v556_v23 = vsel %vm553_vm1, %v555_v21, %v551_v20 }
 0xe39   :  { %v570_v28 = vsub.f32 1.0, %v556_v23  ;;  %v576_v32 = vmul.f32 %v556_v23, %v1429_v57 }
 0xe8f   :  { %v561_v22 = vpop.permute.xlu0 %560 }
 0xe90   :  { %v563_v24 = vmul.f32 %v561_v22, %v556_v23 }
 0xe92   :  { %565 = vrot.lane.b32.xlu1 %v563_v24, %s1223_s17 }
 0xeb4   :  { %v120_v21 = vpop.f32.mrf.mxu0 }
 0xeb5   :  { %v121_v22 = vadd.f32 %v120_v21, %v1325_v29 }
 0xf04   :  { %v566_v25 = vpop.permute.xlu1 %565 }
 0xf05   :  { %v568_v26 = vadd.f32 %v566_v25, %v116_v1 }
 0xf07   :  { %1171 = vtanh.f32 %v568_v26 }
 0xf0d   :  { %v1172_v27 = vpop.eup %1171 }
 0xf0e   :  { %572 = vrot.lane.b32.xlu2 %v1172_v27, %s1224_s3 }
 0xf68   :  { %v573_v30 = vpop.permute.xlu2 %572 }
 0xf69   :  { %v575_v33 = vmul.f32 %v573_v30, %v570_v28 }
 0xf6b   :  { %v1443_v34 = vadd.f32 %v576_v32, %v575_v33 }
 0xf6d   :  { %v580_v35 = vpack.c.bf16 %v1443_v34, %v1443_v34 }
 0xf6f   :  { %582 = vrot.lane.b32.xlu0 %v580_v35, %s1224_s3 }
 0xfe1   :  { %v583_v36 = vpop.permute.xlu0 %582 }
 0xfe2   :  { %1107 = vmatmul.msk.bf16.vlgmr.msrb.gmra.mxu2 %vm146_vm6, %v583_v36 }
 0xfe3   :  { %965 = vmatpush.bf16.msrb.mxu2 %v1278_v9 }
 0xfe7   :  { %966 = vmatpush.bf16.msrb.mxu2 %v1293_v14 }
0x1065   :  { %v596_v37 = vpop.f32.mrf.mxu2 }
0x1066   :  { %v620_v38 = vadd.f32 %v1315_v18, %v596_v37  ;;  %v600_v43 = vadd.f32 %v596_v37, %v118_v42 }
0x1068   :  { %622 = vrot.lane.b32.xlu1 %v620_v38, %s1223_s17  ;;  %v1108_v44 = vmul.f32 -1.442695, %v600_v43 }
0x106a   :  { %1173 = vpow2.f32 %v1108_v44 }
0x106d   :  { %v598_v39 = vpop.f32.mrf.mxu2 }
0x1070   :  { %v1174_v45 = vpop.eup %1173 }
0x1071   :  { %v604_v46 = vadd.f32 1.0, %v1174_v45 }
0x1073   :  { %1175 = vrcp.f32 %v604_v46  ;;  %v616_v52 = vand.u32 2147483648, %v604_v46  ;;  %vm610_vm3 = vweird.f32 %v604_v46  ;;  %v614_v53 = vand.u32 2147483647, %v604_v46 }
0x1075   :  { %v617_v55 = vor.u32 1.1754944e-38, %v616_v52  ;;  %vm615_vm5 = vcmp.eq.f32.partialorder %v614_v53, 8.507059e+37 }
0x1079   :  { %v1176_v47 = vpop.eup %1175 }
0x107a   :  { %v606_v48 = vmul.f32 %v1176_v47, %v604_v46  ;;  %vm611_vm2 = vweird.f32 %v1176_v47 }
0x107b   :  { %vm612_vm4 = vmor %vm610_vm3, %vm611_vm2 }
0x107c   :  { %v607_v49 = vsub.f32 1.0, %v606_v48 }
0x107e   :  { %v608_v50 = vmul.f32 %v1176_v47, %v607_v49 }
0x1080   :  { %v609_v51 = vadd.f32 %v1176_v47, %v608_v50 }
0x1082   :  { %v613_v54 = vsel %vm612_vm4, %v1176_v47, %v609_v51 }
0x1083   :  { %v618_v60 = vsel %vm615_vm5, %v617_v55, %v613_v54  ;;  %v122_v54 = vpop.f32.mrf.mxu0 }
0x1084   :  { %v632_v1 = vsub.f32 1.0, %v618_v60  ;;  %v638_v4 = vmul.f32 %v618_v60, %v1443_v34  ;;  %v123_v55 = vadd.f32 %v122_v54, %v1325_v29 }
0x10da   :  { %v623_v59 = vpop.permute.xlu1 %622 }
0x10db   :  { %v625_v61 = vmul.f32 %v623_v59, %v618_v60 }
0x10dd   :  { %627 = vrot.lane.b32.xlu2 %v625_v61, %s1223_s17 }
0x1137   :  { %v628_v62 = vpop.permute.xlu2 %627 }
0x1138   :  { %v630_v63 = vadd.f32 %v628_v62, %v118_v42 }
0x113a   :  { %1177 = vtanh.f32 %v630_v63 }
0x1140   :  { %v1178_v0 = vpop.eup %1177 }
0x1141   :  { %634 = vrot.lane.b32.xlu0 %v1178_v0, %s1224_s3 }
0x11b3   :  { %v635_v2 = vpop.permute.xlu0 %634 }
0x11b4   :  { %v637_v5 = vmul.f32 %v635_v2, %v632_v1 }
0x11b6   :  { %v1457_v6 = vadd.f32 %v638_v4, %v637_v5 }
0x11b8   :  { %v642_v7 = vpack.c.bf16 %v1457_v6, %v1457_v6 }
0x11ba   :  { %644 = vrot.lane.b32.xlu1 %v642_v7, %s1224_s3 }
0x122c   :  { %v645_v12 = vpop.permute.xlu1 %644 }
0x122d   :  { %1109 = vmatmul.msk.bf16.vlgmr.msra.gmra.mxu3 %vm146_vm6, %v645_v12 }
0x122e   :  { %1027 = vmatpush.bf16.msra.mxu3 %v1278_v9 }
0x1232   :  { %1028 = vmatpush.bf16.msra.mxu3 %v1293_v14 }
0x12b0   :  { %v658_v13 = vpop.f32.mrf.mxu3 }
0x12b1   :  { %v682_v15 = vadd.f32 %v1315_v18, %v658_v13  ;;  %v662_v23 = vadd.f32 %v658_v13, %v121_v22 }
0x12b3   :  { %684 = vrot.lane.b32.xlu2 %v682_v15, %s1223_s17  ;;  %v1110_v24 = vmul.f32 -1.442695, %v662_v23 }
0x12b5   :  { %1179 = vpow2.f32 %v1110_v24 }
0x12b8   :  { %v660_v20 = vpop.f32.mrf.mxu3 }
0x12bb   :  { %v1180_v25 = vpop.eup %1179 }
0x12bc   :  { %v666_v26 = vadd.f32 1.0, %v1180_v25 }
0x12be   :  { %1181 = vrcp.f32 %v666_v26  ;;  %v678_v32 = vand.u32 2147483648, %v666_v26  ;;  %vm672_vm8 = vweird.f32 %v666_v26  ;;  %v676_v33 = vand.u32 2147483647, %v666_v26 }
0x12c0   :  { %v679_v36 = vor.u32 1.1754944e-38, %v678_v32  ;;  %vm677_vm10 = vcmp.eq.f32.partialorder %v676_v33, 8.507059e+37 }
0x12c4   :  { %v1182_v27 = vpop.eup %1181 }
0x12c5   :  { %v668_v28 = vmul.f32 %v1182_v27, %v666_v26  ;;  %vm673_vm7 = vweird.f32 %v1182_v27 }
0x12c6   :  { %vm674_vm9 = vmor %vm672_vm8, %vm673_vm7 }
0x12c7   :  { %v669_v9 = vsub.f32 1.0, %v668_v28  ;;  %v47_v28 = vld [vmem:[%s1588_s0 + $0x50] sm:$0xff] }
0x12c9   :  { %v670_v30 = vmul.f32 %v1182_v27, %v669_v9  ;;  %v48_v9 = vld [vmem:[%s1588_s0 + $0x58] sm:$0xff] }
0x12cb   :  { %v671_v14 = vadd.f32 %v1182_v27, %v670_v30  ;;  %v57_v30 = vpack.c.bf16 %v48_v9, %v47_v28 }
0x12cd   :  { %v675_v35 = vsel %vm674_vm9, %v1182_v27, %v671_v14  ;;  %1090 = vmatmul.msk.bf16.gmra.mxu0 %vm66_vm0, %v57_v30 }
0x12ce   :  { %v680_v38 = vsel %vm677_vm10, %v679_v36, %v675_v35 }
0x12cf   :  { %v694_v44 = vsub.f32 1.0, %v680_v38  ;;  %v700_v46 = vmul.f32 %v680_v38, %v1457_v6 }
0x130d   :  { %v685_v37 = vpop.permute.xlu2 %684 }
0x130e   :  { %v687_v39 = vmul.f32 %v685_v37, %v680_v38 }
0x1310   :  { %689 = vrot.lane.b32.xlu0 %v687_v39, %s1223_s17 }
0x134a   :  { %v125_v36 = vpop.f32.mrf.mxu0 }
0x134b   :  { %v126_v37 = vadd.f32 %v125_v36, %v1325_v29 }
0x1382   :  { %v690_v40 = vpop.permute.xlu0 %689 }
0x1383   :  { %v692_v42 = vadd.f32 %v690_v40, %v121_v22 }
0x1385   :  { %1183 = vtanh.f32 %v692_v42 }
0x138b   :  { %v1184_v43 = vpop.eup %1183 }
0x138c   :  { %696 = vrot.lane.b32.xlu1 %v1184_v43, %s1224_s3 }
0x13fe   :  { %v697_v45 = vpop.permute.xlu1 %696 }
0x13ff   :  { %v699_v47 = vmul.f32 %v697_v45, %v694_v44 }
0x1401   :  { %v1478_v48 = vadd.f32 %v700_v46, %v699_v47 }
0x1403   :  { %v704_v49 = vpack.c.bf16 %v1478_v48, %v1478_v48 }
0x1405   :  { %706 = vrot.lane.b32.xlu2 %v704_v49, %s1224_s3 }
0x145f   :  { %v707_v50 = vpop.permute.xlu2 %706 }
0x1460   :  { %1111 = vmatmul.msk.bf16.vlgmr.msra.gmra.mxu1 %vm146_vm6, %v707_v50 }
0x14dd   :  { %v720_v51 = vpop.f32.mrf.mxu1 }
0x14de   :  { %v744_v52 = vadd.f32 %v1315_v18, %v720_v51  ;;  %v724_v59 = vadd.f32 %v720_v51, %v123_v55 }
0x14e0   :  { %746 = vrot.lane.b32.xlu0 %v744_v52, %s1223_s17  ;;  %v1112_v60 = vmul.f32 -1.442695, %v724_v59 }
0x14e2   :  { %1185 = vpow2.f32 %v1112_v60 }
0x14e5   :  { %v722_v53 = vpop.f32.mrf.mxu1 }
0x14e8   :  { %v1186_v61 = vpop.eup %1185 }
0x14e9   :  { %v728_v62 = vadd.f32 1.0, %v1186_v61 }
0x14eb   :  { %1187 = vrcp.f32 %v728_v62  ;;  %v740_v5 = vand.u32 2147483648, %v728_v62  ;;  %vm734_vm12 = vweird.f32 %v728_v62  ;;  %v738_v7 = vand.u32 2147483647, %v728_v62 }
0x14ed   :  { %v741_v10 = vor.u32 1.1754944e-38, %v740_v5  ;;  %vm739_vm14 = vcmp.eq.f32.partialorder %v738_v7, 8.507059e+37  ;;  %v1518_v7 = vld [vmem:[%s1590_s4] ss:$0 sm:$0xff] }
0x14f1   :  { %v1188_v63 = vpop.eup %1187 }
0x14f2   :  { %v730_v0 = vmul.f32 %v1188_v63, %v728_v62  ;;  %vm735_vm11 = vweird.f32 %v1188_v63 }
0x14f3   :  { %vm736_vm13 = vmor %vm734_vm12, %vm735_vm11 }
0x14f4   :  { %v731_v1 = vsub.f32 1.0, %v730_v0 }
0x14f6   :  { %v732_v2 = vmul.f32 %v1188_v63, %v731_v1 }
0x14f8   :  { %v733_v4 = vadd.f32 %v1188_v63, %v732_v2 }
0x14fa   :  { %v737_v8 = vsel %vm736_vm13, %v1188_v63, %v733_v4 }
0x14fb   :  { %v742_v12 = vsel %vm739_vm14, %v741_v10, %v737_v8 }
0x14fc   :  { %v756_v22 = vsub.f32 1.0, %v742_v12  ;;  %v762_v24 = vmul.f32 %v742_v12, %v1478_v48 }
0x1552   :  { %v747_v11 = vpop.permute.xlu0 %746 }
0x1553   :  { %v749_v13 = vmul.f32 %v747_v11, %v742_v12  ;;  %v127_v11 = vpop.f32.mrf.mxu0 }
0x1554   :  { %v128_v12 = vadd.f32 %v127_v11, %v1325_v29 }
0x1555   :  { %751 = vrot.lane.b32.xlu1 %v749_v13, %s1223_s17 }
0x15c7   :  { %v752_v15 = vpop.permute.xlu1 %751 }
0x15c8   :  { %v754_v20 = vadd.f32 %v752_v15, %v123_v55 }
0x15ca   :  { %1189 = vtanh.f32 %v754_v20 }
0x15d0   :  { %v1190_v21 = vpop.eup %1189 }
0x15d1   :  { %758 = vrot.lane.b32.xlu2 %v1190_v21, %s1224_s3 }
0x162b   :  { %v759_v23 = vpop.permute.xlu2 %758 }
0x162c   :  { %v761_v25 = vmul.f32 %v759_v23, %v756_v22 }
0x162e   :  { %v1490_v26 = vadd.f32 %v762_v24, %v761_v25 }
0x1630   :  { %v766_v27 = vpack.c.bf16 %v1490_v26, %v1490_v26 }
0x1632   :  { %768 = vrot.lane.b32.xlu0 %v766_v27, %s1224_s3 }
0x16a4   :  { %v769_v14 = vpop.permute.xlu0 %768 }
0x16a5   :  { %1113 = vmatmul.msk.bf16.vlgmr.msra.gmra.mxu2 %vm146_vm6, %v769_v14 }
0x1728   :  { %v782_v32 = vpop.f32.mrf.mxu2 }
0x1729   :  { %v806_v33 = vadd.f32 %v1315_v18, %v782_v32  ;;  %v786_v38 = vadd.f32 %v782_v32, %v126_v37 }
0x172b   :  { %808 = vrot.lane.b32.xlu1 %v806_v33, %s1223_s17  ;;  %v1114_v39 = vmul.f32 -1.442695, %v786_v38 }
0x172d   :  { %1191 = vpow2.f32 %v1114_v39 }
0x1730   :  { %v784_v35 = vpop.f32.mrf.mxu2 }
0x1733   :  { %v1192_v40 = vpop.eup %1191 }
0x1734   :  { %v790_v42 = vadd.f32 1.0, %v1192_v40 }
0x1736   :  { %1193 = vrcp.f32 %v790_v42  ;;  %v802_v49 = vand.u32 2147483648, %v790_v42  ;;  %vm796_vm15 = vweird.f32 %v790_v42  ;;  %v800_v18 = vand.u32 2147483647, %v790_v42 }
0x1738   :  { %v803_v51 = vor.u32 1.1754944e-38, %v802_v49  ;;  %vm801_vm2 = vcmp.eq.f32.partialorder %v800_v18, 8.507059e+37 }
0x173c   :  { %v1194_v43 = vpop.eup %1193 }
0x173d   :  { %v792_v44 = vmul.f32 %v1194_v43, %v790_v42  ;;  %vm797_vm0 = vweird.f32 %v1194_v43 }
0x173e   :  { %vm798_vm1 = vmor %vm796_vm15, %vm797_vm0 }
0x173f   :  { %v793_v45 = vsub.f32 1.0, %v792_v44 }
0x1741   :  { %v794_v46 = vmul.f32 %v1194_v43, %v793_v45 }
0x1743   :  { %v795_v47 = vadd.f32 %v1194_v43, %v794_v46 }
0x1745   :  { %v799_v50 = vsel %vm798_vm1, %v1194_v43, %v795_v47 }
0x1746   :  { %v804_v53 = vsel %vm801_vm2, %v803_v51, %v799_v50  ;;  %v131_v50 = vadd.f32 %v1308_v16, %v1325_v29 }
0x1747   :  { %v818_v61 = vsub.f32 1.0, %v804_v53  ;;  %v824_v63 = vmul.f32 %v804_v53, %v1490_v26 }
0x179d   :  { %v809_v52 = vpop.permute.xlu1 %808 }
0x179e   :  { %v811_v54 = vmul.f32 %v809_v52, %v804_v53 }
0x17a0   :  { %813 = vrot.lane.b32.xlu2 %v811_v54, %s1223_s17 }
0x17fa   :  { %v814_v55 = vpop.permute.xlu2 %813 }
0x17fb   :  { %v816_v59 = vadd.f32 %v814_v55, %v126_v37 }
0x17fd   :  { %1195 = vtanh.f32 %v816_v59 }
0x1803   :  { %v1196_v60 = vpop.eup %1195 }
0x1804   :  { %820 = vrot.lane.b32.xlu0 %v1196_v60, %s1224_s3 }
0x1876   :  { %v821_v62 = vpop.permute.xlu0 %820 }
0x1877   :  { %v823_v0 = vmul.f32 %v821_v62, %v818_v61 }
0x1879   :  { %v1509_v1 = vadd.f32 %v824_v63, %v823_v0 }
0x187b   :  { %v828_v2 = vpack.c.bf16 %v1509_v1, %v1509_v1 }
0x187d   :  { %830 = vrot.lane.b32.xlu1 %v828_v2, %s1224_s3 }
0x18ef   :  { %v831_v4 = vpop.permute.xlu1 %830 }
0x18f0   :  { %1115 = vmatmul.msk.bf16.vlgmr.msrb.gmra.mxu3 %vm146_vm6, %v831_v4 }
0x1973   :  { %v844_v5 = vpop.f32.mrf.mxu3 }
0x1974   :  { %v868_v8 = vadd.f32 %v1518_v7, %v844_v5  ;;  %v848_v13 = vadd.f32 %v844_v5, %v128_v12 }
0x1976   :  { %870 = vrot.lane.b32.xlu2 %v868_v8, %s1223_s17  ;;  %v1116_v15 = vmul.f32 -1.442695, %v848_v13 }
0x1978   :  { %1197 = vpow2.f32 %v1116_v15 }
0x197b   :  { %v846_v10 = vpop.f32.mrf.mxu3 }
0x197e   :  { %v1198_v20 = vpop.eup %1197 }
0x197f   :  { %v852_v21 = vadd.f32 1.0, %v1198_v20 }
0x1981   :  { %1199 = vrcp.f32 %v852_v21  ;;  %v864_v28 = vand.u32 2147483648, %v852_v21  ;;  %vm858_vm4 = vweird.f32 %v852_v21  ;;  %v862_v9 = vand.u32 2147483647, %v852_v21 }
0x1983   :  { %v865_v14 = vor.u32 1.1754944e-38, %v864_v28  ;;  %vm863_vm7 = vcmp.eq.f32.partialorder %v862_v9, 8.507059e+37  ;;  %v133_v9 = vadd.f32 %v1310_v17, %v1325_v29 }
0x1987   :  { %v1200_v22 = vpop.eup %1199 }
0x1988   :  { %v854_v23 = vmul.f32 %v1200_v22, %v852_v21  ;;  %vm859_vm3 = vweird.f32 %v1200_v22 }
0x1989   :  { %vm860_vm5 = vmor %vm858_vm4, %vm859_vm3 }
0x198a   :  { %v855_v24 = vsub.f32 1.0, %v854_v23 }
0x198c   :  { %v856_v25 = vmul.f32 %v1200_v22, %v855_v24 }
0x198e   :  { %v857_v27 = vadd.f32 %v1200_v22, %v856_v25 }
0x1990   :  { %v861_v30 = vsel %vm860_vm5, %v1200_v22, %v857_v27 }
0x1991   :  { %v866_v33 = vsel %vm863_vm7, %v865_v14, %v861_v30 }
0x1992   :  { %v880_v39 = vsub.f32 1.0, %v866_v33  ;;  %v886_v42 = vmul.f32 %v866_v33, %v1509_v1 }
0x19d0   :  { %v871_v32 = vpop.permute.xlu2 %870 }
0x19d1   :  { %v873_v35 = vmul.f32 %v871_v32, %v866_v33 }
0x19d3   :  { %875 = vrot.lane.b32.xlu0 %v873_v35, %s1223_s17 }
0x1a45   :  { %v876_v36 = vpop.permute.xlu0 %875 }
0x1a46   :  { %v878_v37 = vadd.f32 %v876_v36, %v128_v12 }
0x1a48   :  { %1201 = vtanh.f32 %v878_v37 }
0x1a4e   :  { %v1202_v38 = vpop.eup %1201 }
0x1a4f   :  { %882 = vrot.lane.b32.xlu1 %v1202_v38, %s1224_s3 }
0x1ac1   :  { %v883_v40 = vpop.permute.xlu1 %882 }
0x1ac2   :  { %v885_v43 = vmul.f32 %v883_v40, %v880_v39 }
0x1ac4   :  { %v1526_v44 = vadd.f32 %v886_v42, %v885_v43 }
0x1ac6   :  { %v890_v45 = vpack.c.bf16 %v1526_v44, %v1526_v44 }
0x1ac8   :  { %892 = vrot.lane.b32.xlu2 %v890_v45, %s1224_s3 }
0x1b22   :  { %v893_v46 = vpop.permute.xlu2 %892 }
0x1b23   :  { %1117 = vmatmul.msk.bf16.vlgmr.msrb.gmra.mxu1 %vm146_vm6, %v893_v46 }
0x1ba0   :  { %v906_v47 = vpop.f32.mrf.mxu1 }
0x1ba1   :  { %v930_v49 = vadd.f32 %v1518_v7, %v906_v47  ;;  %v910_v51 = vadd.f32 %v906_v47, %v131_v50 }
0x1ba3   :  { %932 = vrot.lane.b32.xlu0 %v930_v49, %s1223_s17  ;;  %v1118_v52 = vmul.f32 -1.442695, %v910_v51 }
0x1ba5   :  { %1203 = vpow2.f32 %v1118_v52 }
0x1ba8   :  { %v908_v18 = vpop.f32.mrf.mxu1 }
0x1bab   :  { %v1204_v53 = vpop.eup %1203 }
0x1bac   :  { %v914_v54 = vadd.f32 1.0, %v1204_v53 }
0x1bae   :  { %1205 = vrcp.f32 %v914_v54  ;;  %v926_v63 = vand.u32 2147483648, %v914_v54  ;;  %vm920_vm9 = vweird.f32 %v914_v54  ;;  %v924_v0 = vand.u32 2147483647, %v914_v54 }
0x1bb0   :  { %v927_v4 = vor.u32 1.1754944e-38, %v926_v63  ;;  %vm925_vm11 = vcmp.eq.f32.partialorder %v924_v0, 8.507059e+37 }
0x1bb4   :  { %v1206_v55 = vpop.eup %1205 }
0x1bb5   :  { %v916_v59 = vmul.f32 %v1206_v55, %v914_v54  ;;  %vm921_vm8 = vweird.f32 %v1206_v55 }
0x1bb6   :  { %vm922_vm10 = vmor %vm920_vm9, %vm921_vm8 }
0x1bb7   :  { %v917_v60 = vsub.f32 1.0, %v916_v59 }
0x1bb9   :  { %v918_v61 = vmul.f32 %v1206_v55, %v917_v60 }
0x1bbb   :  { %v919_v62 = vadd.f32 %v1206_v55, %v918_v61 }
0x1bbd   :  { %v923_v2 = vsel %vm922_vm10, %v1206_v55, %v919_v62  ;;  %v139_v55 = vld [vmem:[%s1592_s5] sm:$0xff] }
0x1bbe   :  { %v928_v5 = vsel %vm925_vm11, %v927_v4, %v923_v2  ;;  %vm140_vm15 = vcmp.eq.s32.totalorder %v139_v55, 0 }
0x1bbf   :  { %v942_v13 = vsub.f32 1.0, %v928_v5  ;;  %v948_v20 = vmul.f32 %v928_v5, %v1526_v44  ;;  %v141_v61 = vsel %vm140_vm15, 1, %v139_v55 }
0x1bc0   :  { %v1093_v62 = vadd.s32 4294967295, %v141_v61 }
0x1c15   :  { %v933_v16 = vpop.permute.xlu0 %932 }
0x1c16   :  { %v935_v8 = vmul.f32 %v933_v16, %v928_v5  ;;  %v136_v16 = vadd.f32 %v1341_v58, %v1325_v29 }
0x1c18   :  { %937 = vrot.lane.b32.xlu1 %v935_v8, %s1223_s17 }
0x1c8a   :  { %v938_v10 = vpop.permute.xlu1 %937 }
0x1c8b   :  { %v940_v11 = vadd.f32 %v938_v10, %v131_v50 }
0x1c8d   :  { %1207 = vtanh.f32 %v940_v11 }
0x1c93   :  { %v1208_v12 = vpop.eup %1207 }
0x1c94   :  { %944 = vrot.lane.b32.xlu2 %v1208_v12, %s1224_s3 }
0x1cee   :  { %v945_v15 = vpop.permute.xlu2 %944 }
0x1cef   :  { %v947_v21 = vmul.f32 %v945_v15, %v942_v13 }
0x1cf1   :  { %v1539_v22 = vadd.f32 %v948_v20, %v947_v21 }
0x1cf3   :  { %v952_v23 = vpack.c.bf16 %v1539_v22, %v1539_v22 }
0x1cf5   :  { %954 = vrot.lane.b32.xlu0 %v952_v23, %s1224_s3 }
0x1d67   :  { %v955_v24 = vpop.permute.xlu0 %954 }
0x1d68   :  { %1119 = vmatmul.msk.bf16.vlgmr.msrb.gmra.mxu2 %vm146_vm6, %v955_v24 }
0x1deb   :  { %v968_v25 = vpop.f32.mrf.mxu2 }
0x1dec   :  { %v992_v27 = vadd.f32 %v1518_v7, %v968_v25  ;;  %v972_v30 = vadd.f32 %v968_v25, %v133_v9 }
0x1dee   :  { %994 = vrot.lane.b32.xlu1 %v992_v27, %s1223_s17  ;;  %v1120_v14 = vmul.f32 -1.442695, %v972_v30 }
0x1df0   :  { %1209 = vpow2.f32 %v1120_v14 }
0x1df3   :  { %v970_v28 = vpop.f32.mrf.mxu2 }
0x1df6   :  { %v1210_v32 = vpop.eup %1209 }
0x1df7   :  { %v976_v33 = vadd.f32 1.0, %v1210_v32 }
0x1df9   :  { %1211 = vrcp.f32 %v976_v33  ;;  %v988_v40 = vand.u32 2147483648, %v976_v33  ;;  %vm982_vm13 = vweird.f32 %v976_v33  ;;  %v986_v42 = vand.u32 2147483647, %v976_v33 }
0x1dfb   :  { %v989_v45 = vor.u32 1.1754944e-38, %v988_v40  ;;  %vm987_vm0 = vcmp.eq.f32.partialorder %v986_v42, 8.507059e+37 }
0x1dff   :  { %v1212_v35 = vpop.eup %1211 }
0x1e00   :  { %v978_v36 = vmul.f32 %v1212_v35, %v976_v33  ;;  %vm983_vm12 = vweird.f32 %v1212_v35 }
0x1e01   :  { %vm984_vm14 = vmor %vm982_vm13, %vm983_vm12 }
0x1e02   :  { %v979_v37 = vsub.f32 1.0, %v978_v36 }
0x1e04   :  { %v980_v38 = vmul.f32 %v1212_v35, %v979_v37 }
0x1e06   :  { %v981_v39 = vadd.f32 %v1212_v35, %v980_v38 }
0x1e08   :  { %v985_v43 = vsel %vm984_vm14, %v1212_v35, %v981_v39 }
0x1e09   :  { %v990_v46 = vsel %vm987_vm0, %v989_v45, %v985_v43 }
0x1e0a   :  { %v1004_v51 = vsub.f32 1.0, %v990_v46  ;;  %v1010_v53 = vmul.f32 %v990_v46, %v1539_v22 }
0x1e60   :  { %v995_v17 = vpop.permute.xlu1 %994 }
0x1e61   :  { %v997_v47 = vmul.f32 %v995_v17, %v990_v46 }
0x1e63   :  { %999 = vrot.lane.b32.xlu2 %v997_v47, %s1223_s17 }
0x1ebd   :  { %v1000_v49 = vpop.permute.xlu2 %999 }
0x1ebe   :  { %v1002_v18 = vadd.f32 %v1000_v49, %v133_v9 }
0x1ec0   :  { %1213 = vtanh.f32 %v1002_v18 }
0x1ec6   :  { %v1214_v50 = vpop.eup %1213 }
0x1ec7   :  { %1006 = vrot.lane.b32.xlu0 %v1214_v50, %s1224_s3 }
0x1f39   :  { %v1007_v52 = vpop.permute.xlu0 %1006 }
0x1f3a   :  { %v1009_v54 = vmul.f32 %v1007_v52, %v1004_v51 }
0x1f3c   :  { %v1555_v59 = vadd.f32 %v1010_v53, %v1009_v54 }
0x1f3e   :  { %v1014_v60 = vpack.c.bf16 %v1555_v59, %v1555_v59 }
0x1f40   :  { %1016 = vrot.lane.b32.xlu1 %v1014_v60, %s1224_s3 }
0x1f48   :  { %144 = vperm.xlu1 %1128, %v1093_v62  }
0x1fb2   :  { %v1017_v63 = vpop.permute.xlu1 %1016 }
0x1fb3   :  { %1121 = vmatmul.msk.bf16.vlgmr.msra.gmra.mxu3 %vm146_vm6, %v1017_v63 }
0x1fba   :  { %v145_v14 = vpop.permute.xlu1 %144 }
0x1fbb   :  { %vm206_vm5 = vcmp.eq.s32.totalorder %v145_v14, 0  ;;  %vm268_vm7 = vcmp.eq.s32.totalorder %v145_v14, 1  ;;  %vm330_vm8 = vcmp.eq.s32.totalorder %v145_v14, 2  ;;  %vm392_vm9 = vcmp.eq.s32.totalorder %v145_v14, 3 }
0x1fbc   :  { %v207_v32 = vsel %vm206_vm5, %v1336_v56, 0.0  ;;  %vm454_vm10 = vcmp.eq.s32.totalorder %v145_v14, 4  ;;  %vm516_vm11 = vcmp.eq.s32.totalorder %v145_v14, 5  ;;  %vm578_vm12 = vcmp.eq.s32.totalorder %v145_v14, 6 }
0x1fbd   :  { %v269_v33 = vsel %vm268_vm7, %v1352_v31, %v207_v32  ;;  %vm640_vm13 = vcmp.eq.s32.totalorder %v145_v14, 7  ;;  %vm702_vm14 = vcmp.eq.s32.totalorder %v145_v14, 8  ;;  %vm764_vm0 = vcmp.eq.s32.totalorder %v145_v14, 9 }
0x1fbe   :  { %v331_v35 = vsel %vm330_vm8, %v1373_v3, %v269_v33  ;;  %vm826_vm15 = vcmp.eq.s32.totalorder %v145_v14, 10 }
0x1fbf   :  { %v393_v36 = vsel %vm392_vm9, %v1387_v41, %v331_v35 }
0x1fc0   :  { %v455_v37 = vsel %vm454_vm10, %v1408_v19, %v393_v36 }
0x1fc1   :  { %v517_v38 = vsel %vm516_vm11, %v1429_v57, %v455_v37 }
0x1fc2   :  { %v579_v39 = vsel %vm578_vm12, %v1443_v34, %v517_v38 }
0x1fc3   :  { %v641_v56 = vsel %vm640_vm13, %v1457_v6, %v579_v39 }
0x1fc4   :  { %v703_v31 = vsel %vm702_vm14, %v1478_v48, %v641_v56 }
0x1fc5   :  { %v765_v3 = vsel %vm764_vm0, %v1490_v26, %v703_v31 }
0x1fc6   :  { %v827_v41 = vsel %vm826_vm15, %v1509_v1, %v765_v3 }
0x2036   :  { %v1030_v0 = vpop.f32.mrf.mxu3 }
0x2037   :  { %v1054_v2 = vadd.f32 %v1518_v7, %v1030_v0  ;;  %v1034_v5 = vadd.f32 %v1030_v0, %v136_v16 }
0x2039   :  { %1056 = vrot.lane.b32.xlu2 %v1054_v2, %s1223_s17  ;;  %v1122_v8 = vmul.f32 -1.442695, %v1034_v5 }
0x203b   :  { %1215 = vpow2.f32 %v1122_v8 }
0x203e   :  { %v1032_v4 = vpop.f32.mrf.mxu3 }
0x2041   :  { %v1216_v10 = vpop.eup %1215 }
0x2042   :  { %v1038_v11 = vadd.f32 1.0, %v1216_v10 }
0x2044   :  { %1217 = vrcp.f32 %v1038_v11  ;;  %v1050_v23 = vand.u32 2147483648, %v1038_v11  ;;  %vm1044_vm2 = vweird.f32 %v1038_v11  ;;  %v1048_v7 = vand.u32 2147483647, %v1038_v11 }
0x2046   :  { %v1051_v25 = vor.u32 1.1754944e-38, %v1050_v23  ;;  %vm1049_vm4 = vcmp.eq.f32.partialorder %v1048_v7, 8.507059e+37 }
0x204a   :  { %v1218_v12 = vpop.eup %1217 }
0x204b   :  { %v1040_v13 = vmul.f32 %v1218_v12, %v1038_v11  ;;  %vm1045_vm1 = vweird.f32 %v1218_v12 }
0x204c   :  { %vm1046_vm3 = vmor %vm1044_vm2, %vm1045_vm1  ;;  %vm888_vm1 = vcmp.eq.s32.totalorder %v145_v14, 11  ;;  %vm950_vm2 = vcmp.eq.s32.totalorder %v145_v14, 12 }
0x204d   :  { %v1041_v15 = vsub.f32 1.0, %v1040_v13  ;;  %v889_v19 = vsel %vm888_vm1, %v1526_v44, %v827_v41 }
0x204e   :  { %v951_v6 = vsel %vm950_vm2, %v1539_v22, %v889_v19 }
0x204f   :  { %v1042_v20 = vmul.f32 %v1218_v12, %v1041_v15 }
0x2051   :  { %v1043_v21 = vadd.f32 %v1218_v12, %v1042_v20 }
0x2053   :  { %v1047_v24 = vsel %vm1046_vm3, %v1218_v12, %v1043_v21  ;;  %vm1012_vm3 = vcmp.eq.s32.totalorder %v145_v14, 13 }
0x2054   :  { %v1052_v58 = vsel %vm1049_vm4, %v1051_v25, %v1047_v24  ;;  %v1013_v48 = vsel %vm1012_vm3, %v1555_v59, %v951_v6  ;;  %vm1074_vm4 = vcmp.eq.s32.totalorder %v145_v14, 14 }
0x2055   :  { %v1066_v57 = vsub.f32 1.0, %v1052_v58  ;;  %v1072_v34 = vmul.f32 %v1052_v58, %v1555_v59 }
0x2093   :  { %v1057_v29 = vpop.permute.xlu2 %1056 }
0x2094   :  { %v1059_v27 = vmul.f32 %v1057_v29, %v1052_v58 }
0x2096   :  { %1061 = vrot.lane.b32.xlu0 %v1059_v27, %s1223_s17 }
0x2108   :  { %v1062_v28 = vpop.permute.xlu0 %1061 }
0x2109   :  { %v1064_v9 = vadd.f32 %v1062_v28, %v136_v16 }
0x210b   :  { %1219 = vtanh.f32 %v1064_v9 }
0x2111   :  { %v1220_v30 = vpop.eup %1219 }
0x2112   :  { %1068 = vrot.lane.b32.xlu2 %v1220_v30, %s1224_s3 }
0x216c   :  { %v1069_v40 = vpop.permute.xlu2 %1068 }
0x216d   :  { %v1071_v42 = vmul.f32 %v1069_v40, %v1066_v57 }
0x216f   :  { %v1073_v43 = vadd.f32 %v1072_v34, %v1071_v42 }
0x2171   :  { %v1075_v26 = vsel %vm1074_vm4, %v1073_v43, %v1013_v48 }
0x2172   :  { %1077 = vrot.lane.b32.xlu0 %v1075_v26, %s1224_s3 }
0x21e4   :  { %v1078_v1 = vpop.permute.xlu0 %1077 }
0x21e5   :  { %1080 = vst.msk [vmem:[%s1593_s6] sm:$0xff] %vm146_vm6, %v1078_v1 }

</bundles_post_ra>
